<compile_context>
chip_gen: v7x
topology: tpu7x:2x2x1
jax: 0.10.0
libtpu: 0.0.40
codegen_flags: <defaults>
</compile_context>

<pallas_src>
import functools
from dataclasses import dataclass

import jax
import jax.numpy as jnp
from jax.experimental import pallas as pl
from jax.experimental.pallas import tpu as pltpu


# --------------------------------------------------------------------------
# In-kernel pre-LN transformer block on a VMEM-resident (M, D) slab.
# Attention is restricted to independent groups of `glen` consecutive rows
# (M = groups * glen): groups = segments for the SW phase, groups = batch
# elements for the compact-representative CS phase.
# --------------------------------------------------------------------------
def _layer_norm(z, g, b, eps=1e-5):
    mu = jnp.mean(z, axis=-1, keepdims=True)
    var = jnp.mean((z - mu) ** 2, axis=-1, keepdims=True)
    return (z - mu) * jax.lax.rsqrt(var + eps) * g + b


def _tblock(x, wq, wk, wv, wo, w1, w2, vec, b1, *, heads, dk, groups, glen):
    """x: (M, D) f32, M = groups*glen.
    wq/wk: (D, H*dk) bf16, wv: (D, H*dv) bf16, wo: (H*dv, D) bf16,
    w1: (D, FF) bf16, w2: (FF, D) bf16, b1: (1, FF) f32.
    vec: (6, D) f32 rows = [ln1_g, ln1_b, attn_out_b, ln2_g, ln2_b, mlp_out_b]."""
    M, D = x.shape
    dv = D // heads
    scale = dk ** -0.5
    bdot = (((2,), (2,)), ((0,), (0,)))   # (G,L,c) x (G,L,c) -> (G,L,L)
    pvdot = (((2,), (1,)), ((0,), (0,)))  # (G,L,L) x (G,L,dv) -> (G,L,dv)

    h = _layer_norm(x, vec[0:1, :], vec[1:2, :]).astype(jnp.bfloat16)

    # Head-batched projections: one full-width MXU matmul each (f32 accumulate).
    q = (jnp.dot(h, wq, preferred_element_type=jnp.float32) * scale
         ).astype(jnp.bfloat16)                                    # (M, H*dk)
    k = jnp.dot(h, wk, preferred_element_type=jnp.float32).astype(jnp.bfloat16)
    v = jnp.dot(h, wv, preferred_element_type=jnp.float32).astype(jnp.bfloat16)

    attn = jnp.zeros((M, D), jnp.float32)
    for hh in range(heads):   # static unroll; heads is small (2)
        qh = q[:, hh * dk:(hh + 1) * dk].reshape(groups, glen, dk)
        kh = k[:, hh * dk:(hh + 1) * dk].reshape(groups, glen, dk)
        vh = v[:, hh * dv:(hh + 1) * dv].reshape(groups, glen, dv)
        # Group-batched scores; softmax stays in f32.
        s = jax.lax.dot_general(qh, kh, bdot,
                                preferred_element_type=jnp.float32)  # (G,L,L)
        s = s - jnp.max(s, axis=-1, keepdims=True)
        p = jnp.exp(s)
        p = p * pl.reciprocal(jnp.sum(p, axis=-1, keepdims=True), approx=True)
        oh = jax.lax.dot_general(p.astype(jnp.bfloat16), vh, pvdot,
                                 preferred_element_type=jnp.float32)  # (G,L,dv)
        oh = oh.reshape(M, dv).astype(jnp.bfloat16)
        attn = attn + jnp.dot(oh, wo[hh * dv:(hh + 1) * dv, :],
                              preferred_element_type=jnp.float32)

    x1 = x + attn + vec[2:3, :]                        # residual 1 (f32)
    h2 = _layer_norm(x1, vec[3:4, :], vec[4:5, :]).astype(jnp.bfloat16)
    m = jnp.dot(h2, w1, preferred_element_type=jnp.float32) + b1
    m = jax.nn.gelu(m, approximate=True).astype(jnp.bfloat16)
    return x1 + jnp.dot(m, w2, preferred_element_type=jnp.float32) + vec[5:6, :]


# --------------------------------------------------------------------------
# Fused H_TBlock kernel: `batch_block` batch elements per grid step, both
# phases on-chip, representatives gathered/scattered via a VMEM scratch.
# --------------------------------------------------------------------------
def h_tblock_kernel(x_ref, wq_ref, wk_ref, wv_ref, wo_ref, w1_ref, w2_ref,
                    vec_ref, b1_ref, o_ref, rep_ref, *, heads, dk, sl, rl):
    Bt, N, D = x_ref.shape
    nseg = N // sl
    nrep = nseg * rl

    def params(blk):                                   # blk: 0 = SW, 1 = CS
        return (wq_ref[blk], wk_ref[blk], wv_ref[blk], wo_ref[blk],
                w1_ref[blk], w2_ref[blk], vec_ref[blk], b1_ref[blk])

    # ---- Phase 1: segment-wise attention (block-diagonal via seg batching).
    x = x_ref[...].reshape(Bt * N, D).astype(jnp.float32)
    y = _tblock(x, *params(0), heads=heads, dk=dk,
                groups=Bt * nseg, glen=sl)
    o_ref[...] = y.reshape(Bt, N, D).astype(o_ref.dtype)

    # ---- Phase 2: attention among segment representatives only.
    # Gather the first `rl` rows of every segment into a compact scratch
    # (static masked sublane copies through the refs; no (N,N) masks).
    for i in range(nseg):
        rep_ref[:, i * rl:(i + 1) * rl, :] = o_ref[:, sl * i: sl * i + rl, :]

    reps = rep_ref[...].reshape(Bt * nrep, D).astype(jnp.float32)
    z = _tblock(reps, *params(1), heads=heads, dk=dk,
                groups=Bt, glen=nrep)
    rep_ref[...] = z.reshape(Bt, nrep, D)

    # Scatter representatives back; non-representative rows keep phase-1 output.
    for i in range(nseg):
        o_ref[:, sl * i: sl * i + rl, :] = (
            rep_ref[:, i * rl:(i + 1) * rl, :].astype(o_ref.dtype))


def _pack_block_params(params):
    """(H,D,dk)/(H,D,dv)/(H,dv,D) per-head weights -> head-batched 2D, bf16."""
    wq, wk, wv, wo, w1, w2, vec, b1 = params
    H, D, DK = wq.shape
    DV = wv.shape[2]
    bf = jnp.bfloat16
    return (wq.transpose(1, 0, 2).reshape(D, H * DK).astype(bf),
            wk.transpose(1, 0, 2).reshape(D, H * DK).astype(bf),
            wv.transpose(1, 0, 2).reshape(D, H * DV).astype(bf),
            wo.reshape(H * DV, D).astype(bf),
            w1.astype(bf), w2.astype(bf),
            vec.astype(jnp.float32), b1.astype(jnp.float32))


def h_tblock(x, sw_params, cs_params, cfg, *, batch_block=1):
    B, N, D = x.shape
    assert N == cfg.input_length and N % cfg.segment_length == 0
    assert cfg.heads * cfg.dim_value == D, "heads * dim_value must equal dim"
    assert B % batch_block == 0
    nseg = N // cfg.segment_length
    nrep = nseg * cfg.representative_length
    Bt = batch_block

    # Stack SW and CS parameter sets along a new leading axis (size 2).
    packed = [jnp.stack([a, b])
              for a, b in zip(_pack_block_params(sw_params),
                              _pack_block_params(cs_params))]

    kernel = functools.partial(
        h_tblock_kernel, heads=cfg.heads, dk=cfg.attn_dim_key,
        sl=cfg.segment_length, rl=cfg.representative_length)

    in_specs = [pl.BlockSpec((Bt, N, D), lambda b: (b, 0, 0))]
    # Grid-invariant weights: constant block index -> DMA'd once.
    # TODO(synk): at production D/FF on v7x, single-buffer these
    #   (pipeline_mode) and set an explicit vmem_limit_bytes.
    in_specs += [pl.BlockSpec(p.shape, lambda b, _n=p.ndim: (0,) * _n)
                 for p in packed]

    return pl.pallas_call(
        kernel,
        out_shape=jax.ShapeDtypeStruct((B, N, D), x.dtype),
        grid=(B // Bt,),
        in_specs=in_specs,
        out_specs=pl.BlockSpec((Bt, N, D), lambda b: (b, 0, 0)),
        scratch_shapes=[pltpu.VMEM((Bt, nrep, D), jnp.float32)],
        compiler_params=pltpu.CompilerParams(
            dimension_semantics=("parallel",)),
    )(x, *packed)


# --------------------------------------------------------------------------
# Config + parameter construction
# --------------------------------------------------------------------------
@dataclass
class Config:
    dim: int = 32
    heads: int = 2
    attn_dim_key: int = 16
    segment_length: int = 8
    input_length: int = 32
    representative_length: int = 4
    ff_mult: int = 2

    @property
    def n_segments(self):
        return self.input_length // self.segment_length

    @property
    def dim_value(self):
        return self.dim // self.heads


def make_tblock_params(key, cfg):
    D, H, DK, DV = cfg.dim, cfg.heads, cfg.attn_dim_key, cfg.dim_value
    FF = cfg.ff_mult * D
    ks = jax.random.split(key, 6)
    s = 0.02
    wq = s * jax.random.normal(ks[0], (H, D, DK), jnp.float32)
    wk = s * jax.random.normal(ks[1], (H, D, DK), jnp.float32)
    wv = s * jax.random.normal(ks[2], (H, D, DV), jnp.float32)
    wo = s * jax.random.normal(ks[3], (H, DV, D), jnp.float32)
    w1 = s * jax.random.normal(ks[4], (D, FF), jnp.float32)
    w2 = s * jax.random.normal(ks[5], (FF, D), jnp.float32)
    vec = jnp.stack([jnp.ones((D,)),  jnp.zeros((D,)), jnp.zeros((D,)),
                     jnp.ones((D,)),  jnp.zeros((D,)), jnp.zeros((D,))]
                    ).astype(jnp.float32)                      # (6, D)
    b1 = jnp.zeros((1, FF), jnp.float32)
    return (wq, wk, wv, wo, w1, w2, vec, b1)


if __name__ == "__main__":
    cfg = Config()
    key = jax.random.PRNGKey(0)
    kx, ksw, kcs = jax.random.split(key, 3)

    B = 2
    x = jax.random.normal(kx, (B, cfg.input_length, cfg.dim), jnp.float32)

    sw_params = make_tblock_params(ksw, cfg)   # SW_Attn.segment_wise block
    cs_params = make_tblock_params(kcs, cfg)   # CS_Attn.attn block

    out = jax.jit(functools.partial(h_tblock, cfg=cfg))(x, sw_params, cs_params)
    out = jax.block_until_ready(out)
    assert out.shape == x.shape and bool(jnp.all(jnp.isfinite(out)))
    print("KERNEL_OK")
</pallas_src>

<mosaic_0001>
module attributes {stable_mosaic.version = 11 : i64} {
  func.func @h_tblock_kernel(%arg0: i32, %arg1: memref<1x32x32xf32, #tpu.memory_space<vmem>>, %arg2: memref<2x32x32xbf16, #tpu.memory_space<vmem>>, %arg3: memref<2x32x32xbf16, #tpu.memory_space<vmem>>, %arg4: memref<2x32x32xbf16, #tpu.memory_space<vmem>>, %arg5: memref<2x32x32xbf16, #tpu.memory_space<vmem>>, %arg6: memref<2x32x64xbf16, #tpu.memory_space<vmem>>, %arg7: memref<2x64x32xbf16, #tpu.memory_space<vmem>>, %arg8: memref<2x6x32xf32, #tpu.memory_space<vmem>>, %arg9: memref<2x1x64xf32, #tpu.memory_space<vmem>>, %arg10: memref<1x32x32xf32, #tpu.memory_space<vmem>>, %arg11: memref<1x16x32xf32, #tpu.memory_space<vmem>>) attributes {dimension_semantics = [#tpu.dimension_semantics<parallel>], iteration_bounds = array<i64: 2>, scalar_prefetch = 0 : i64, scratch_operands = 1 : i64, tpu.core_type = #tpu.core_type<tc>, window_params = [{transform_indices = @transform_0, window_bounds = array<i64: 1, 32, 32>}, {pipeline_mode = #tpu.pipeline_mode<synchronous>, transform_indices = @transform_1, window_bounds = array<i64: 2, 32, 32>}, {pipeline_mode = #tpu.pipeline_mode<synchronous>, transform_indices = @transform_2, window_bounds = array<i64: 2, 32, 32>}, {pipeline_mode = #tpu.pipeline_mode<synchronous>, transform_indices = @transform_3, window_bounds = array<i64: 2, 32, 32>}, {pipeline_mode = #tpu.pipeline_mode<synchronous>, transform_indices = @transform_4, window_bounds = array<i64: 2, 32, 32>}, {pipeline_mode = #tpu.pipeline_mode<synchronous>, transform_indices = @transform_5, window_bounds = array<i64: 2, 32, 64>}, {pipeline_mode = #tpu.pipeline_mode<synchronous>, transform_indices = @transform_6, window_bounds = array<i64: 2, 64, 32>}, {pipeline_mode = #tpu.pipeline_mode<synchronous>, transform_indices = @transform_7, window_bounds = array<i64: 2, 6, 32>}, {pipeline_mode = #tpu.pipeline_mode<synchronous>, transform_indices = @transform_8, window_bounds = array<i64: 2, 1, 64>}, {transform_indices = @transform_9, window_bounds = array<i64: 1, 32, 32>}]} {
    %c0 = arith.constant 0 : index
    %c0_0 = arith.constant 0 : index
    %c0_1 = arith.constant 0 : index
    %0 = vector.load %arg1[%c0, %c0_0, %c0_1] : memref<1x32x32xf32, #tpu.memory_space<vmem>>, vector<1x32x32xf32>
    %1 = vector.shape_cast %0 : vector<1x32x32xf32> to vector<32x32xf32>
    %c0_2 = arith.constant 0 : index
    %c0_3 = arith.constant 0 : index
    %c0_4 = arith.constant 0 : index
    %2 = vector.load %arg2[%c0_2, %c0_3, %c0_4] : memref<2x32x32xbf16, #tpu.memory_space<vmem>>, vector<1x32x32xbf16>
    %3 = vector.shape_cast %2 : vector<1x32x32xbf16> to vector<32x32xbf16>
    %c0_5 = arith.constant 0 : index
    %c0_6 = arith.constant 0 : index
    %c0_7 = arith.constant 0 : index
    %4 = vector.load %arg3[%c0_5, %c0_6, %c0_7] : memref<2x32x32xbf16, #tpu.memory_space<vmem>>, vector<1x32x32xbf16>
    %5 = vector.shape_cast %4 : vector<1x32x32xbf16> to vector<32x32xbf16>
    %c0_8 = arith.constant 0 : index
    %c0_9 = arith.constant 0 : index
    %c0_10 = arith.constant 0 : index
    %6 = vector.load %arg4[%c0_8, %c0_9, %c0_10] : memref<2x32x32xbf16, #tpu.memory_space<vmem>>, vector<1x32x32xbf16>
    %7 = vector.shape_cast %6 : vector<1x32x32xbf16> to vector<32x32xbf16>
    %c0_11 = arith.constant 0 : index
    %c0_12 = arith.constant 0 : index
    %c0_13 = arith.constant 0 : index
    %8 = vector.load %arg5[%c0_11, %c0_12, %c0_13] : memref<2x32x32xbf16, #tpu.memory_space<vmem>>, vector<1x32x32xbf16>
    %9 = vector.shape_cast %8 : vector<1x32x32xbf16> to vector<32x32xbf16>
    %c0_14 = arith.constant 0 : index
    %c0_15 = arith.constant 0 : index
    %c0_16 = arith.constant 0 : index
    %10 = vector.load %arg6[%c0_14, %c0_15, %c0_16] : memref<2x32x64xbf16, #tpu.memory_space<vmem>>, vector<1x32x64xbf16>
    %11 = vector.shape_cast %10 : vector<1x32x64xbf16> to vector<32x64xbf16>
    %c0_17 = arith.constant 0 : index
    %c0_18 = arith.constant 0 : index
    %c0_19 = arith.constant 0 : index
    %12 = vector.load %arg7[%c0_17, %c0_18, %c0_19] : memref<2x64x32xbf16, #tpu.memory_space<vmem>>, vector<1x64x32xbf16>
    %13 = vector.shape_cast %12 : vector<1x64x32xbf16> to vector<64x32xbf16>
    %c0_20 = arith.constant 0 : index
    %c0_21 = arith.constant 0 : index
    %c0_22 = arith.constant 0 : index
    %14 = vector.load %arg8[%c0_20, %c0_21, %c0_22] : memref<2x6x32xf32, #tpu.memory_space<vmem>>, vector<1x6x32xf32>
    %15 = vector.shape_cast %14 : vector<1x6x32xf32> to vector<6x32xf32>
    %c0_23 = arith.constant 0 : index
    %c0_24 = arith.constant 0 : index
    %c0_25 = arith.constant 0 : index
    %16 = vector.load %arg9[%c0_23, %c0_24, %c0_25] : memref<2x1x64xf32, #tpu.memory_space<vmem>>, vector<1x1x64xf32>
    %17 = vector.shape_cast %16 : vector<1x1x64xf32> to vector<1x64xf32>
    %18 = vector.extract_strided_slice %15 {offsets = [0, 0], sizes = [1, 32], strides = [1, 1]} : vector<6x32xf32> to vector<1x32xf32>
    %19 = vector.extract_strided_slice %15 {offsets = [1, 0], sizes = [1, 32], strides = [1, 1]} : vector<6x32xf32> to vector<1x32xf32>
    %cst = arith.constant dense<0.000000e+00> : vector<32xf32>
    %20 = vector.multi_reduction <add>, %1, %cst [1] : vector<32x32xf32> to vector<32xf32>
    %21 = vector.shape_cast %20 : vector<32xf32> to vector<32x1xf32>
    %cst_26 = arith.constant 3.200000e+01 : f32
    %22 = vector.broadcast %cst_26 : f32 to vector<32x1xf32>
    %23 = arith.divf %21, %22 : vector<32x1xf32>
    %24 = vector.broadcast %23 : vector<32x1xf32> to vector<32x32xf32>
    %25 = arith.subf %1, %24 : vector<32x32xf32>
    %26 = arith.mulf %25, %25 : vector<32x32xf32>
    %cst_27 = arith.constant dense<0.000000e+00> : vector<32xf32>
    %27 = vector.multi_reduction <add>, %26, %cst_27 [1] : vector<32x32xf32> to vector<32xf32>
    %28 = vector.shape_cast %27 : vector<32xf32> to vector<32x1xf32>
    %cst_28 = arith.constant 3.200000e+01 : f32
    %29 = vector.broadcast %cst_28 : f32 to vector<32x1xf32>
    %30 = arith.divf %28, %29 : vector<32x1xf32>
    %31 = vector.broadcast %23 : vector<32x1xf32> to vector<32x32xf32>
    %32 = arith.subf %1, %31 : vector<32x32xf32>
    %cst_29 = arith.constant 9.99999974E-6 : f32
    %33 = vector.broadcast %cst_29 : f32 to vector<32x1xf32>
    %34 = arith.addf %30, %33 : vector<32x1xf32>
    %35 = math.rsqrt %34 : vector<32x1xf32>
    %36 = vector.broadcast %35 : vector<32x1xf32> to vector<32x32xf32>
    %37 = arith.mulf %32, %36 : vector<32x32xf32>
    %38 = vector.broadcast %18 : vector<1x32xf32> to vector<32x32xf32>
    %39 = arith.mulf %37, %38 : vector<32x32xf32>
    %40 = vector.broadcast %19 : vector<1x32xf32> to vector<32x32xf32>
    %41 = arith.addf %39, %40 : vector<32x32xf32>
    %42 = arith.truncf %41 : vector<32x32xf32> to vector<32x32xbf16>
    %cst_30 = arith.constant dense<0.000000e+00> : vector<32x32xf32>
    %43 = tpu.matmul %42, %3, %cst_30 {dimension_numbers = #tpu.dot_dimension_numbers<[1], [0], [0], [1], [0, 0, 1, 1], [], []>} : vector<32x32xbf16>, vector<32x32xbf16>, vector<32x32xf32> -> vector<32x32xf32>
    %cst_31 = arith.constant 2.500000e-01 : f32
    %44 = vector.broadcast %cst_31 : f32 to vector<32x32xf32>
    %45 = arith.mulf %43, %44 : vector<32x32xf32>
    %46 = arith.truncf %45 : vector<32x32xf32> to vector<32x32xbf16>
    %cst_32 = arith.constant dense<0.000000e+00> : vector<32x32xf32>
    %47 = tpu.matmul %42, %5, %cst_32 {dimension_numbers = #tpu.dot_dimension_numbers<[1], [0], [0], [1], [0, 0, 1, 1], [], []>} : vector<32x32xbf16>, vector<32x32xbf16>, vector<32x32xf32> -> vector<32x32xf32>
    %48 = arith.truncf %47 : vector<32x32xf32> to vector<32x32xbf16>
    %cst_33 = arith.constant dense<0.000000e+00> : vector<32x32xf32>
    %49 = tpu.matmul %42, %7, %cst_33 {dimension_numbers = #tpu.dot_dimension_numbers<[1], [0], [0], [1], [0, 0, 1, 1], [], []>} : vector<32x32xbf16>, vector<32x32xbf16>, vector<32x32xf32> -> vector<32x32xf32>
    %50 = arith.truncf %49 : vector<32x32xf32> to vector<32x32xbf16>
    %cst_34 = arith.constant 0.000000e+00 : f32
    %51 = vector.broadcast %cst_34 : f32 to vector<32x32xf32>
    %52 = vector.extract_strided_slice %46 {offsets = [0, 0], sizes = [32, 16], strides = [1, 1]} : vector<32x32xbf16> to vector<32x16xbf16>
    %53 = vector.shape_cast %52 : vector<32x16xbf16> to vector<4x8x16xbf16>
    %54 = vector.extract_strided_slice %48 {offsets = [0, 0], sizes = [32, 16], strides = [1, 1]} : vector<32x32xbf16> to vector<32x16xbf16>
    %55 = vector.shape_cast %54 : vector<32x16xbf16> to vector<4x8x16xbf16>
    %56 = vector.extract_strided_slice %50 {offsets = [0, 0], sizes = [32, 16], strides = [1, 1]} : vector<32x32xbf16> to vector<32x16xbf16>
    %57 = vector.shape_cast %56 : vector<32x16xbf16> to vector<4x8x16xbf16>
    %cst_35 = arith.constant dense<0.000000e+00> : vector<4x8x8xf32>
    %58 = tpu.matmul %53, %55, %cst_35 {dimension_numbers = #tpu.dot_dimension_numbers<[2], [2], [1], [1], [0, 0, 0, 1, 1, 1], [0], [0]>} : vector<4x8x16xbf16>, vector<4x8x16xbf16>, vector<4x8x8xf32> -> vector<4x8x8xf32>
    %cst_36 = arith.constant dense<0xFF800000> : vector<4x8xf32>
    %59 = vector.multi_reduction <maximumf>, %58, %cst_36 [2] : vector<4x8x8xf32> to vector<4x8xf32>
    %60 = vector.shape_cast %59 : vector<4x8xf32> to vector<4x8x1xf32>
    %61 = vector.broadcast %60 : vector<4x8x1xf32> to vector<4x8x8xf32>
    %62 = arith.subf %58, %61 : vector<4x8x8xf32>
    %63 = math.exp %62 : vector<4x8x8xf32>
    %cst_37 = arith.constant dense<0.000000e+00> : vector<4x8xf32>
    %64 = vector.multi_reduction <add>, %63, %cst_37 [2] : vector<4x8x8xf32> to vector<4x8xf32>
    %65 = vector.shape_cast %64 : vector<4x8xf32> to vector<4x8x1xf32>
    %66 = tpu.reciprocal %65 {approx = true} : vector<4x8x1xf32> -> vector<4x8x1xf32>
    %67 = vector.broadcast %66 : vector<4x8x1xf32> to vector<4x8x8xf32>
    %68 = arith.mulf %63, %67 : vector<4x8x8xf32>
    %69 = arith.truncf %68 : vector<4x8x8xf32> to vector<4x8x8xbf16>
    %cst_38 = arith.constant dense<0.000000e+00> : vector<4x8x16xf32>
    %70 = tpu.matmul %69, %57, %cst_38 {dimension_numbers = #tpu.dot_dimension_numbers<[2], [1], [1], [2], [0, 0, 0, 1, 1, 2], [0], [0]>} : vector<4x8x8xbf16>, vector<4x8x16xbf16>, vector<4x8x16xf32> -> vector<4x8x16xf32>
    %71 = vector.shape_cast %70 : vector<4x8x16xf32> to vector<32x16xf32>
    %72 = arith.truncf %71 : vector<32x16xf32> to vector<32x16xbf16>
    %73 = vector.extract_strided_slice %9 {offsets = [0, 0], sizes = [16, 32], strides = [1, 1]} : vector<32x32xbf16> to vector<16x32xbf16>
    %cst_39 = arith.constant dense<0.000000e+00> : vector<32x32xf32>
    %74 = tpu.matmul %72, %73, %cst_39 {dimension_numbers = #tpu.dot_dimension_numbers<[1], [0], [0], [1], [0, 0, 1, 1], [], []>} : vector<32x16xbf16>, vector<16x32xbf16>, vector<32x32xf32> -> vector<32x32xf32>
    %75 = arith.addf %51, %74 : vector<32x32xf32>
    %76 = vector.extract_strided_slice %46 {offsets = [0, 16], sizes = [32, 16], strides = [1, 1]} : vector<32x32xbf16> to vector<32x16xbf16>
    %77 = vector.shape_cast %76 : vector<32x16xbf16> to vector<4x8x16xbf16>
    %78 = vector.extract_strided_slice %48 {offsets = [0, 16], sizes = [32, 16], strides = [1, 1]} : vector<32x32xbf16> to vector<32x16xbf16>
    %79 = vector.shape_cast %78 : vector<32x16xbf16> to vector<4x8x16xbf16>
    %80 = vector.extract_strided_slice %50 {offsets = [0, 16], sizes = [32, 16], strides = [1, 1]} : vector<32x32xbf16> to vector<32x16xbf16>
    %81 = vector.shape_cast %80 : vector<32x16xbf16> to vector<4x8x16xbf16>
    %cst_40 = arith.constant dense<0.000000e+00> : vector<4x8x8xf32>
    %82 = tpu.matmul %77, %79, %cst_40 {dimension_numbers = #tpu.dot_dimension_numbers<[2], [2], [1], [1], [0, 0, 0, 1, 1, 1], [0], [0]>} : vector<4x8x16xbf16>, vector<4x8x16xbf16>, vector<4x8x8xf32> -> vector<4x8x8xf32>
    %cst_41 = arith.constant dense<0xFF800000> : vector<4x8xf32>
    %83 = vector.multi_reduction <maximumf>, %82, %cst_41 [2] : vector<4x8x8xf32> to vector<4x8xf32>
    %84 = vector.shape_cast %83 : vector<4x8xf32> to vector<4x8x1xf32>
    %85 = vector.broadcast %84 : vector<4x8x1xf32> to vector<4x8x8xf32>
    %86 = arith.subf %82, %85 : vector<4x8x8xf32>
    %87 = math.exp %86 : vector<4x8x8xf32>
    %cst_42 = arith.constant dense<0.000000e+00> : vector<4x8xf32>
    %88 = vector.multi_reduction <add>, %87, %cst_42 [2] : vector<4x8x8xf32> to vector<4x8xf32>
    %89 = vector.shape_cast %88 : vector<4x8xf32> to vector<4x8x1xf32>
    %90 = tpu.reciprocal %89 {approx = true} : vector<4x8x1xf32> -> vector<4x8x1xf32>
    %91 = vector.broadcast %90 : vector<4x8x1xf32> to vector<4x8x8xf32>
    %92 = arith.mulf %87, %91 : vector<4x8x8xf32>
    %93 = arith.truncf %92 : vector<4x8x8xf32> to vector<4x8x8xbf16>
    %cst_43 = arith.constant dense<0.000000e+00> : vector<4x8x16xf32>
    %94 = tpu.matmul %93, %81, %cst_43 {dimension_numbers = #tpu.dot_dimension_numbers<[2], [1], [1], [2], [0, 0, 0, 1, 1, 2], [0], [0]>} : vector<4x8x8xbf16>, vector<4x8x16xbf16>, vector<4x8x16xf32> -> vector<4x8x16xf32>
    %95 = vector.shape_cast %94 : vector<4x8x16xf32> to vector<32x16xf32>
    %96 = arith.truncf %95 : vector<32x16xf32> to vector<32x16xbf16>
    %97 = vector.extract_strided_slice %9 {offsets = [16, 0], sizes = [16, 32], strides = [1, 1]} : vector<32x32xbf16> to vector<16x32xbf16>
    %cst_44 = arith.constant dense<0.000000e+00> : vector<32x32xf32>
    %98 = tpu.matmul %96, %97, %cst_44 {dimension_numbers = #tpu.dot_dimension_numbers<[1], [0], [0], [1], [0, 0, 1, 1], [], []>} : vector<32x16xbf16>, vector<16x32xbf16>, vector<32x32xf32> -> vector<32x32xf32>
    %99 = arith.addf %75, %98 : vector<32x32xf32>
    %100 = arith.addf %1, %99 : vector<32x32xf32>
    %101 = vector.extract_strided_slice %15 {offsets = [2, 0], sizes = [1, 32], strides = [1, 1]} : vector<6x32xf32> to vector<1x32xf32>
    %102 = vector.broadcast %101 : vector<1x32xf32> to vector<32x32xf32>
    %103 = arith.addf %100, %102 : vector<32x32xf32>
    %104 = vector.extract_strided_slice %15 {offsets = [3, 0], sizes = [1, 32], strides = [1, 1]} : vector<6x32xf32> to vector<1x32xf32>
    %105 = vector.extract_strided_slice %15 {offsets = [4, 0], sizes = [1, 32], strides = [1, 1]} : vector<6x32xf32> to vector<1x32xf32>
    %cst_45 = arith.constant dense<0.000000e+00> : vector<32xf32>
    %106 = vector.multi_reduction <add>, %103, %cst_45 [1] : vector<32x32xf32> to vector<32xf32>
    %107 = vector.shape_cast %106 : vector<32xf32> to vector<32x1xf32>
    %cst_46 = arith.constant 3.200000e+01 : f32
    %108 = vector.broadcast %cst_46 : f32 to vector<32x1xf32>
    %109 = arith.divf %107, %108 : vector<32x1xf32>
    %110 = vector.broadcast %109 : vector<32x1xf32> to vector<32x32xf32>
    %111 = arith.subf %103, %110 : vector<32x32xf32>
    %112 = arith.mulf %111, %111 : vector<32x32xf32>
    %cst_47 = arith.constant dense<0.000000e+00> : vector<32xf32>
    %113 = vector.multi_reduction <add>, %112, %cst_47 [1] : vector<32x32xf32> to vector<32xf32>
    %114 = vector.shape_cast %113 : vector<32xf32> to vector<32x1xf32>
    %cst_48 = arith.constant 3.200000e+01 : f32
    %115 = vector.broadcast %cst_48 : f32 to vector<32x1xf32>
    %116 = arith.divf %114, %115 : vector<32x1xf32>
    %117 = vector.broadcast %109 : vector<32x1xf32> to vector<32x32xf32>
    %118 = arith.subf %103, %117 : vector<32x32xf32>
    %cst_49 = arith.constant 9.99999974E-6 : f32
    %119 = vector.broadcast %cst_49 : f32 to vector<32x1xf32>
    %120 = arith.addf %116, %119 : vector<32x1xf32>
    %121 = math.rsqrt %120 : vector<32x1xf32>
    %122 = vector.broadcast %121 : vector<32x1xf32> to vector<32x32xf32>
    %123 = arith.mulf %118, %122 : vector<32x32xf32>
    %124 = vector.broadcast %104 : vector<1x32xf32> to vector<32x32xf32>
    %125 = arith.mulf %123, %124 : vector<32x32xf32>
    %126 = vector.broadcast %105 : vector<1x32xf32> to vector<32x32xf32>
    %127 = arith.addf %125, %126 : vector<32x32xf32>
    %128 = arith.truncf %127 : vector<32x32xf32> to vector<32x32xbf16>
    %cst_50 = arith.constant dense<0.000000e+00> : vector<32x64xf32>
    %129 = tpu.matmul %128, %11, %cst_50 {dimension_numbers = #tpu.dot_dimension_numbers<[1], [0], [0], [1], [0, 0, 1, 1], [], []>} : vector<32x32xbf16>, vector<32x64xbf16>, vector<32x64xf32> -> vector<32x64xf32>
    %130 = vector.broadcast %17 : vector<1x64xf32> to vector<32x64xf32>
    %131 = arith.addf %129, %130 : vector<32x64xf32>
    %132 = arith.mulf %131, %131 : vector<32x64xf32>
    %133 = arith.mulf %131, %132 : vector<32x64xf32>
    %cst_51 = arith.constant 4.471500e-02 : f32
    %134 = vector.broadcast %cst_51 : f32 to vector<32x64xf32>
    %135 = arith.mulf %134, %133 : vector<32x64xf32>
    %136 = arith.addf %131, %135 : vector<32x64xf32>
    %cst_52 = arith.constant 0.797884583 : f32
    %137 = vector.broadcast %cst_52 : f32 to vector<32x64xf32>
    %138 = arith.mulf %137, %136 : vector<32x64xf32>
    %139 = math.tanh %138 : vector<32x64xf32>
    %cst_53 = arith.constant 1.000000e+00 : f32
    %140 = vector.broadcast %cst_53 : f32 to vector<32x64xf32>
    %141 = arith.addf %140, %139 : vector<32x64xf32>
    %cst_54 = arith.constant 5.000000e-01 : f32
    %142 = vector.broadcast %cst_54 : f32 to vector<32x64xf32>
    %143 = arith.mulf %142, %141 : vector<32x64xf32>
    %144 = arith.mulf %131, %143 : vector<32x64xf32>
    %145 = arith.truncf %144 : vector<32x64xf32> to vector<32x64xbf16>
    %cst_55 = arith.constant dense<0.000000e+00> : vector<32x32xf32>
    %146 = tpu.matmul %145, %13, %cst_55 {dimension_numbers = #tpu.dot_dimension_numbers<[1], [0], [0], [1], [0, 0, 1, 1], [], []>} : vector<32x64xbf16>, vector<64x32xbf16>, vector<32x32xf32> -> vector<32x32xf32>
    %147 = arith.addf %103, %146 : vector<32x32xf32>
    %148 = vector.extract_strided_slice %15 {offsets = [5, 0], sizes = [1, 32], strides = [1, 1]} : vector<6x32xf32> to vector<1x32xf32>
    %149 = vector.broadcast %148 : vector<1x32xf32> to vector<32x32xf32>
    %150 = arith.addf %147, %149 : vector<32x32xf32>
    %151 = vector.shape_cast %150 : vector<32x32xf32> to vector<1x32x32xf32>
    %c0_56 = arith.constant 0 : index
    %c0_57 = arith.constant 0 : index
    %c0_58 = arith.constant 0 : index
    %152 = vector.load %arg10[%c0_56, %c0_57, %c0_58] : memref<1x32x32xf32, #tpu.memory_space<vmem>>, vector<1x32x32xf32>
    tpu.vector_store %arg10[%c0_56, %c0_57, %c0_58], %151 {strides = array<i32>} : memref<1x32x32xf32, #tpu.memory_space<vmem>>, vector<1x32x32xf32>,
    %c0_59 = arith.constant 0 : index
    %c0_60 = arith.constant 0 : index
    %c0_61 = arith.constant 0 : index
    %153 = vector.load %arg10[%c0_59, %c0_60, %c0_61] : memref<1x32x32xf32, #tpu.memory_space<vmem>>, vector<1x4x32xf32>
    %c0_62 = arith.constant 0 : index
    %c0_63 = arith.constant 0 : index
    %c0_64 = arith.constant 0 : index
    %154 = vector.load %arg11[%c0_62, %c0_63, %c0_64] : memref<1x16x32xf32, #tpu.memory_space<vmem>>, vector<1x4x32xf32>
    tpu.vector_store %arg11[%c0_62, %c0_63, %c0_64], %153 {strides = array<i32>} : memref<1x16x32xf32, #tpu.memory_space<vmem>>, vector<1x4x32xf32>,
    %c0_65 = arith.constant 0 : index
    %c8 = arith.constant 8 : index
    %c0_66 = arith.constant 0 : index
    %155 = vector.load %arg10[%c0_65, %c8, %c0_66] : memref<1x32x32xf32, #tpu.memory_space<vmem>>, vector<1x4x32xf32>
    %c0_67 = arith.constant 0 : index
    %c4 = arith.constant 4 : index
    %c0_68 = arith.constant 0 : index
    %156 = vector.load %arg11[%c0_67, %c4, %c0_68] : memref<1x16x32xf32, #tpu.memory_space<vmem>>, vector<1x4x32xf32>
    tpu.vector_store %arg11[%c0_67, %c4, %c0_68], %155 {strides = array<i32>} : memref<1x16x32xf32, #tpu.memory_space<vmem>>, vector<1x4x32xf32>,
    %c0_69 = arith.constant 0 : index
    %c16 = arith.constant 16 : index
    %c0_70 = arith.constant 0 : index
    %157 = vector.load %arg10[%c0_69, %c16, %c0_70] : memref<1x32x32xf32, #tpu.memory_space<vmem>>, vector<1x4x32xf32>
    %c0_71 = arith.constant 0 : index
    %c8_72 = arith.constant 8 : index
    %c0_73 = arith.constant 0 : index
    %158 = vector.load %arg11[%c0_71, %c8_72, %c0_73] : memref<1x16x32xf32, #tpu.memory_space<vmem>>, vector<1x4x32xf32>
    tpu.vector_store %arg11[%c0_71, %c8_72, %c0_73], %157 {strides = array<i32>} : memref<1x16x32xf32, #tpu.memory_space<vmem>>, vector<1x4x32xf32>,
    %c0_74 = arith.constant 0 : index
    %c24 = arith.constant 24 : index
    %c0_75 = arith.constant 0 : index
    %159 = vector.load %arg10[%c0_74, %c24, %c0_75] : memref<1x32x32xf32, #tpu.memory_space<vmem>>, vector<1x4x32xf32>
    %c0_76 = arith.constant 0 : index
    %c12 = arith.constant 12 : index
    %c0_77 = arith.constant 0 : index
    %160 = vector.load %arg11[%c0_76, %c12, %c0_77] : memref<1x16x32xf32, #tpu.memory_space<vmem>>, vector<1x4x32xf32>
    tpu.vector_store %arg11[%c0_76, %c12, %c0_77], %159 {strides = array<i32>} : memref<1x16x32xf32, #tpu.memory_space<vmem>>, vector<1x4x32xf32>,
    %c0_78 = arith.constant 0 : index
    %c0_79 = arith.constant 0 : index
    %c0_80 = arith.constant 0 : index
    %161 = vector.load %arg11[%c0_78, %c0_79, %c0_80] : memref<1x16x32xf32, #tpu.memory_space<vmem>>, vector<1x16x32xf32>
    %162 = vector.shape_cast %161 : vector<1x16x32xf32> to vector<16x32xf32>
    %c1 = arith.constant 1 : index
    %c0_81 = arith.constant 0 : index
    %c0_82 = arith.constant 0 : index
    %163 = vector.load %arg2[%c1, %c0_81, %c0_82] : memref<2x32x32xbf16, #tpu.memory_space<vmem>>, vector<1x32x32xbf16>
    %164 = vector.shape_cast %163 : vector<1x32x32xbf16> to vector<32x32xbf16>
    %c1_83 = arith.constant 1 : index
    %c0_84 = arith.constant 0 : index
    %c0_85 = arith.constant 0 : index
    %165 = vector.load %arg3[%c1_83, %c0_84, %c0_85] : memref<2x32x32xbf16, #tpu.memory_space<vmem>>, vector<1x32x32xbf16>
    %166 = vector.shape_cast %165 : vector<1x32x32xbf16> to vector<32x32xbf16>
    %c1_86 = arith.constant 1 : index
    %c0_87 = arith.constant 0 : index
    %c0_88 = arith.constant 0 : index
    %167 = vector.load %arg4[%c1_86, %c0_87, %c0_88] : memref<2x32x32xbf16, #tpu.memory_space<vmem>>, vector<1x32x32xbf16>
    %168 = vector.shape_cast %167 : vector<1x32x32xbf16> to vector<32x32xbf16>
    %c1_89 = arith.constant 1 : index
    %c0_90 = arith.constant 0 : index
    %c0_91 = arith.constant 0 : index
    %169 = vector.load %arg5[%c1_89, %c0_90, %c0_91] : memref<2x32x32xbf16, #tpu.memory_space<vmem>>, vector<1x32x32xbf16>
    %170 = vector.shape_cast %169 : vector<1x32x32xbf16> to vector<32x32xbf16>
    %c1_92 = arith.constant 1 : index
    %c0_93 = arith.constant 0 : index
    %c0_94 = arith.constant 0 : index
    %171 = vector.load %arg6[%c1_92, %c0_93, %c0_94] : memref<2x32x64xbf16, #tpu.memory_space<vmem>>, vector<1x32x64xbf16>
    %172 = vector.shape_cast %171 : vector<1x32x64xbf16> to vector<32x64xbf16>
    %c1_95 = arith.constant 1 : index
    %c0_96 = arith.constant 0 : index
    %c0_97 = arith.constant 0 : index
    %173 = vector.load %arg7[%c1_95, %c0_96, %c0_97] : memref<2x64x32xbf16, #tpu.memory_space<vmem>>, vector<1x64x32xbf16>
    %174 = vector.shape_cast %173 : vector<1x64x32xbf16> to vector<64x32xbf16>
    %c1_98 = arith.constant 1 : index
    %c0_99 = arith.constant 0 : index
    %c0_100 = arith.constant 0 : index
    %175 = vector.load %arg8[%c1_98, %c0_99, %c0_100] : memref<2x6x32xf32, #tpu.memory_space<vmem>>, vector<1x6x32xf32>
    %176 = vector.shape_cast %175 : vector<1x6x32xf32> to vector<6x32xf32>
    %c1_101 = arith.constant 1 : index
    %c0_102 = arith.constant 0 : index
    %c0_103 = arith.constant 0 : index
    %177 = vector.load %arg9[%c1_101, %c0_102, %c0_103] : memref<2x1x64xf32, #tpu.memory_space<vmem>>, vector<1x1x64xf32>
    %178 = vector.shape_cast %177 : vector<1x1x64xf32> to vector<1x64xf32>
    %179 = vector.extract_strided_slice %176 {offsets = [0, 0], sizes = [1, 32], strides = [1, 1]} : vector<6x32xf32> to vector<1x32xf32>
    %180 = vector.extract_strided_slice %176 {offsets = [1, 0], sizes = [1, 32], strides = [1, 1]} : vector<6x32xf32> to vector<1x32xf32>
    %cst_104 = arith.constant dense<0.000000e+00> : vector<16xf32>
    %181 = vector.multi_reduction <add>, %162, %cst_104 [1] : vector<16x32xf32> to vector<16xf32>
    %182 = vector.shape_cast %181 : vector<16xf32> to vector<16x1xf32>
    %cst_105 = arith.constant 3.200000e+01 : f32
    %183 = vector.broadcast %cst_105 : f32 to vector<16x1xf32>
    %184 = arith.divf %182, %183 : vector<16x1xf32>
    %185 = vector.broadcast %184 : vector<16x1xf32> to vector<16x32xf32>
    %186 = arith.subf %162, %185 : vector<16x32xf32>
    %187 = arith.mulf %186, %186 : vector<16x32xf32>
    %cst_106 = arith.constant dense<0.000000e+00> : vector<16xf32>
    %188 = vector.multi_reduction <add>, %187, %cst_106 [1] : vector<16x32xf32> to vector<16xf32>
    %189 = vector.shape_cast %188 : vector<16xf32> to vector<16x1xf32>
    %cst_107 = arith.constant 3.200000e+01 : f32
    %190 = vector.broadcast %cst_107 : f32 to vector<16x1xf32>
    %191 = arith.divf %189, %190 : vector<16x1xf32>
    %192 = vector.broadcast %184 : vector<16x1xf32> to vector<16x32xf32>
    %193 = arith.subf %162, %192 : vector<16x32xf32>
    %cst_108 = arith.constant 9.99999974E-6 : f32
    %194 = vector.broadcast %cst_108 : f32 to vector<16x1xf32>
    %195 = arith.addf %191, %194 : vector<16x1xf32>
    %196 = math.rsqrt %195 : vector<16x1xf32>
    %197 = vector.broadcast %196 : vector<16x1xf32> to vector<16x32xf32>
    %198 = arith.mulf %193, %197 : vector<16x32xf32>
    %199 = vector.broadcast %179 : vector<1x32xf32> to vector<16x32xf32>
    %200 = arith.mulf %198, %199 : vector<16x32xf32>
    %201 = vector.broadcast %180 : vector<1x32xf32> to vector<16x32xf32>
    %202 = arith.addf %200, %201 : vector<16x32xf32>
    %203 = arith.truncf %202 : vector<16x32xf32> to vector<16x32xbf16>
    %cst_109 = arith.constant dense<0.000000e+00> : vector<16x32xf32>
    %204 = tpu.matmul %203, %164, %cst_109 {dimension_numbers = #tpu.dot_dimension_numbers<[1], [0], [0], [1], [0, 0, 1, 1], [], []>} : vector<16x32xbf16>, vector<32x32xbf16>, vector<16x32xf32> -> vector<16x32xf32>
    %cst_110 = arith.constant 2.500000e-01 : f32
    %205 = vector.broadcast %cst_110 : f32 to vector<16x32xf32>
    %206 = arith.mulf %204, %205 : vector<16x32xf32>
    %207 = arith.truncf %206 : vector<16x32xf32> to vector<16x32xbf16>
    %cst_111 = arith.constant dense<0.000000e+00> : vector<16x32xf32>
    %208 = tpu.matmul %203, %166, %cst_111 {dimension_numbers = #tpu.dot_dimension_numbers<[1], [0], [0], [1], [0, 0, 1, 1], [], []>} : vector<16x32xbf16>, vector<32x32xbf16>, vector<16x32xf32> -> vector<16x32xf32>
    %209 = arith.truncf %208 : vector<16x32xf32> to vector<16x32xbf16>
    %cst_112 = arith.constant dense<0.000000e+00> : vector<16x32xf32>
    %210 = tpu.matmul %203, %168, %cst_112 {dimension_numbers = #tpu.dot_dimension_numbers<[1], [0], [0], [1], [0, 0, 1, 1], [], []>} : vector<16x32xbf16>, vector<32x32xbf16>, vector<16x32xf32> -> vector<16x32xf32>
    %211 = arith.truncf %210 : vector<16x32xf32> to vector<16x32xbf16>
    %cst_113 = arith.constant 0.000000e+00 : f32
    %212 = vector.broadcast %cst_113 : f32 to vector<16x32xf32>
    %213 = vector.extract_strided_slice %207 {offsets = [0, 0], sizes = [16, 16], strides = [1, 1]} : vector<16x32xbf16> to vector<16x16xbf16>
    %214 = vector.shape_cast %213 : vector<16x16xbf16> to vector<1x16x16xbf16>
    %215 = vector.extract_strided_slice %209 {offsets = [0, 0], sizes = [16, 16], strides = [1, 1]} : vector<16x32xbf16> to vector<16x16xbf16>
    %216 = vector.shape_cast %215 : vector<16x16xbf16> to vector<1x16x16xbf16>
    %217 = vector.extract_strided_slice %211 {offsets = [0, 0], sizes = [16, 16], strides = [1, 1]} : vector<16x32xbf16> to vector<16x16xbf16>
    %218 = vector.shape_cast %217 : vector<16x16xbf16> to vector<1x16x16xbf16>
    %cst_114 = arith.constant dense<0.000000e+00> : vector<1x16x16xf32>
    %219 = tpu.matmul %214, %216, %cst_114 {dimension_numbers = #tpu.dot_dimension_numbers<[2], [2], [1], [1], [0, 0, 0, 1, 1, 1], [0], [0]>} : vector<1x16x16xbf16>, vector<1x16x16xbf16>, vector<1x16x16xf32> -> vector<1x16x16xf32>
    %cst_115 = arith.constant dense<0xFF800000> : vector<1x16xf32>
    %220 = vector.multi_reduction <maximumf>, %219, %cst_115 [2] : vector<1x16x16xf32> to vector<1x16xf32>
    %221 = vector.shape_cast %220 : vector<1x16xf32> to vector<1x16x1xf32>
    %222 = vector.broadcast %221 : vector<1x16x1xf32> to vector<1x16x16xf32>
    %223 = arith.subf %219, %222 : vector<1x16x16xf32>
    %224 = math.exp %223 : vector<1x16x16xf32>
    %cst_116 = arith.constant dense<0.000000e+00> : vector<1x16xf32>
    %225 = vector.multi_reduction <add>, %224, %cst_116 [2] : vector<1x16x16xf32> to vector<1x16xf32>
    %226 = vector.shape_cast %225 : vector<1x16xf32> to vector<1x16x1xf32>
    %227 = tpu.reciprocal %226 {approx = true} : vector<1x16x1xf32> -> vector<1x16x1xf32>
    %228 = vector.broadcast %227 : vector<1x16x1xf32> to vector<1x16x16xf32>
    %229 = arith.mulf %224, %228 : vector<1x16x16xf32>
    %230 = arith.truncf %229 : vector<1x16x16xf32> to vector<1x16x16xbf16>
    %cst_117 = arith.constant dense<0.000000e+00> : vector<1x16x16xf32>
    %231 = tpu.matmul %230, %218, %cst_117 {dimension_numbers = #tpu.dot_dimension_numbers<[2], [1], [1], [2], [0, 0, 0, 1, 1, 2], [0], [0]>} : vector<1x16x16xbf16>, vector<1x16x16xbf16>, vector<1x16x16xf32> -> vector<1x16x16xf32>
    %232 = vector.shape_cast %231 : vector<1x16x16xf32> to vector<16x16xf32>
    %233 = arith.truncf %232 : vector<16x16xf32> to vector<16x16xbf16>
    %234 = vector.extract_strided_slice %170 {offsets = [0, 0], sizes = [16, 32], strides = [1, 1]} : vector<32x32xbf16> to vector<16x32xbf16>
    %cst_118 = arith.constant dense<0.000000e+00> : vector<16x32xf32>
    %235 = tpu.matmul %233, %234, %cst_118 {dimension_numbers = #tpu.dot_dimension_numbers<[1], [0], [0], [1], [0, 0, 1, 1], [], []>} : vector<16x16xbf16>, vector<16x32xbf16>, vector<16x32xf32> -> vector<16x32xf32>
    %236 = arith.addf %212, %235 : vector<16x32xf32>
    %237 = vector.extract_strided_slice %207 {offsets = [0, 16], sizes = [16, 16], strides = [1, 1]} : vector<16x32xbf16> to vector<16x16xbf16>
    %238 = vector.shape_cast %237 : vector<16x16xbf16> to vector<1x16x16xbf16>
    %239 = vector.extract_strided_slice %209 {offsets = [0, 16], sizes = [16, 16], strides = [1, 1]} : vector<16x32xbf16> to vector<16x16xbf16>
    %240 = vector.shape_cast %239 : vector<16x16xbf16> to vector<1x16x16xbf16>
    %241 = vector.extract_strided_slice %211 {offsets = [0, 16], sizes = [16, 16], strides = [1, 1]} : vector<16x32xbf16> to vector<16x16xbf16>
    %242 = vector.shape_cast %241 : vector<16x16xbf16> to vector<1x16x16xbf16>
    %cst_119 = arith.constant dense<0.000000e+00> : vector<1x16x16xf32>
    %243 = tpu.matmul %238, %240, %cst_119 {dimension_numbers = #tpu.dot_dimension_numbers<[2], [2], [1], [1], [0, 0, 0, 1, 1, 1], [0], [0]>} : vector<1x16x16xbf16>, vector<1x16x16xbf16>, vector<1x16x16xf32> -> vector<1x16x16xf32>
    %cst_120 = arith.constant dense<0xFF800000> : vector<1x16xf32>
    %244 = vector.multi_reduction <maximumf>, %243, %cst_120 [2] : vector<1x16x16xf32> to vector<1x16xf32>
    %245 = vector.shape_cast %244 : vector<1x16xf32> to vector<1x16x1xf32>
    %246 = vector.broadcast %245 : vector<1x16x1xf32> to vector<1x16x16xf32>
    %247 = arith.subf %243, %246 : vector<1x16x16xf32>
    %248 = math.exp %247 : vector<1x16x16xf32>
    %cst_121 = arith.constant dense<0.000000e+00> : vector<1x16xf32>
    %249 = vector.multi_reduction <add>, %248, %cst_121 [2] : vector<1x16x16xf32> to vector<1x16xf32>
    %250 = vector.shape_cast %249 : vector<1x16xf32> to vector<1x16x1xf32>
    %251 = tpu.reciprocal %250 {approx = true} : vector<1x16x1xf32> -> vector<1x16x1xf32>
    %252 = vector.broadcast %251 : vector<1x16x1xf32> to vector<1x16x16xf32>
    %253 = arith.mulf %248, %252 : vector<1x16x16xf32>
    %254 = arith.truncf %253 : vector<1x16x16xf32> to vector<1x16x16xbf16>
    %cst_122 = arith.constant dense<0.000000e+00> : vector<1x16x16xf32>
    %255 = tpu.matmul %254, %242, %cst_122 {dimension_numbers = #tpu.dot_dimension_numbers<[2], [1], [1], [2], [0, 0, 0, 1, 1, 2], [0], [0]>} : vector<1x16x16xbf16>, vector<1x16x16xbf16>, vector<1x16x16xf32> -> vector<1x16x16xf32>
    %256 = vector.shape_cast %255 : vector<1x16x16xf32> to vector<16x16xf32>
    %257 = arith.truncf %256 : vector<16x16xf32> to vector<16x16xbf16>
    %258 = vector.extract_strided_slice %170 {offsets = [16, 0], sizes = [16, 32], strides = [1, 1]} : vector<32x32xbf16> to vector<16x32xbf16>
    %cst_123 = arith.constant dense<0.000000e+00> : vector<16x32xf32>
    %259 = tpu.matmul %257, %258, %cst_123 {dimension_numbers = #tpu.dot_dimension_numbers<[1], [0], [0], [1], [0, 0, 1, 1], [], []>} : vector<16x16xbf16>, vector<16x32xbf16>, vector<16x32xf32> -> vector<16x32xf32>
    %260 = arith.addf %236, %259 : vector<16x32xf32>
    %261 = arith.addf %162, %260 : vector<16x32xf32>
    %262 = vector.extract_strided_slice %176 {offsets = [2, 0], sizes = [1, 32], strides = [1, 1]} : vector<6x32xf32> to vector<1x32xf32>
    %263 = vector.broadcast %262 : vector<1x32xf32> to vector<16x32xf32>
    %264 = arith.addf %261, %263 : vector<16x32xf32>
    %265 = vector.extract_strided_slice %176 {offsets = [3, 0], sizes = [1, 32], strides = [1, 1]} : vector<6x32xf32> to vector<1x32xf32>
    %266 = vector.extract_strided_slice %176 {offsets = [4, 0], sizes = [1, 32], strides = [1, 1]} : vector<6x32xf32> to vector<1x32xf32>
    %cst_124 = arith.constant dense<0.000000e+00> : vector<16xf32>
    %267 = vector.multi_reduction <add>, %264, %cst_124 [1] : vector<16x32xf32> to vector<16xf32>
    %268 = vector.shape_cast %267 : vector<16xf32> to vector<16x1xf32>
    %cst_125 = arith.constant 3.200000e+01 : f32
    %269 = vector.broadcast %cst_125 : f32 to vector<16x1xf32>
    %270 = arith.divf %268, %269 : vector<16x1xf32>
    %271 = vector.broadcast %270 : vector<16x1xf32> to vector<16x32xf32>
    %272 = arith.subf %264, %271 : vector<16x32xf32>
    %273 = arith.mulf %272, %272 : vector<16x32xf32>
    %cst_126 = arith.constant dense<0.000000e+00> : vector<16xf32>
    %274 = vector.multi_reduction <add>, %273, %cst_126 [1] : vector<16x32xf32> to vector<16xf32>
    %275 = vector.shape_cast %274 : vector<16xf32> to vector<16x1xf32>
    %cst_127 = arith.constant 3.200000e+01 : f32
    %276 = vector.broadcast %cst_127 : f32 to vector<16x1xf32>
    %277 = arith.divf %275, %276 : vector<16x1xf32>
    %278 = vector.broadcast %270 : vector<16x1xf32> to vector<16x32xf32>
    %279 = arith.subf %264, %278 : vector<16x32xf32>
    %cst_128 = arith.constant 9.99999974E-6 : f32
    %280 = vector.broadcast %cst_128 : f32 to vector<16x1xf32>
    %281 = arith.addf %277, %280 : vector<16x1xf32>
    %282 = math.rsqrt %281 : vector<16x1xf32>
    %283 = vector.broadcast %282 : vector<16x1xf32> to vector<16x32xf32>
    %284 = arith.mulf %279, %283 : vector<16x32xf32>
    %285 = vector.broadcast %265 : vector<1x32xf32> to vector<16x32xf32>
    %286 = arith.mulf %284, %285 : vector<16x32xf32>
    %287 = vector.broadcast %266 : vector<1x32xf32> to vector<16x32xf32>
    %288 = arith.addf %286, %287 : vector<16x32xf32>
    %289 = arith.truncf %288 : vector<16x32xf32> to vector<16x32xbf16>
    %cst_129 = arith.constant dense<0.000000e+00> : vector<16x64xf32>
    %290 = tpu.matmul %289, %172, %cst_129 {dimension_numbers = #tpu.dot_dimension_numbers<[1], [0], [0], [1], [0, 0, 1, 1], [], []>} : vector<16x32xbf16>, vector<32x64xbf16>, vector<16x64xf32> -> vector<16x64xf32>
    %291 = vector.broadcast %178 : vector<1x64xf32> to vector<16x64xf32>
    %292 = arith.addf %290, %291 : vector<16x64xf32>
    %293 = arith.mulf %292, %292 : vector<16x64xf32>
    %294 = arith.mulf %292, %293 : vector<16x64xf32>
    %cst_130 = arith.constant 4.471500e-02 : f32
    %295 = vector.broadcast %cst_130 : f32 to vector<16x64xf32>
    %296 = arith.mulf %295, %294 : vector<16x64xf32>
    %297 = arith.addf %292, %296 : vector<16x64xf32>
    %cst_131 = arith.constant 0.797884583 : f32
    %298 = vector.broadcast %cst_131 : f32 to vector<16x64xf32>
    %299 = arith.mulf %298, %297 : vector<16x64xf32>
    %300 = math.tanh %299 : vector<16x64xf32>
    %cst_132 = arith.constant 1.000000e+00 : f32
    %301 = vector.broadcast %cst_132 : f32 to vector<16x64xf32>
    %302 = arith.addf %301, %300 : vector<16x64xf32>
    %cst_133 = arith.constant 5.000000e-01 : f32
    %303 = vector.broadcast %cst_133 : f32 to vector<16x64xf32>
    %304 = arith.mulf %303, %302 : vector<16x64xf32>
    %305 = arith.mulf %292, %304 : vector<16x64xf32>
    %306 = arith.truncf %305 : vector<16x64xf32> to vector<16x64xbf16>
    %cst_134 = arith.constant dense<0.000000e+00> : vector<16x32xf32>
    %307 = tpu.matmul %306, %174, %cst_134 {dimension_numbers = #tpu.dot_dimension_numbers<[1], [0], [0], [1], [0, 0, 1, 1], [], []>} : vector<16x64xbf16>, vector<64x32xbf16>, vector<16x32xf32> -> vector<16x32xf32>
    %308 = arith.addf %264, %307 : vector<16x32xf32>
    %309 = vector.extract_strided_slice %176 {offsets = [5, 0], sizes = [1, 32], strides = [1, 1]} : vector<6x32xf32> to vector<1x32xf32>
    %310 = vector.broadcast %309 : vector<1x32xf32> to vector<16x32xf32>
    %311 = arith.addf %308, %310 : vector<16x32xf32>
    %312 = vector.shape_cast %311 : vector<16x32xf32> to vector<1x16x32xf32>
    %c0_135 = arith.constant 0 : index
    %c0_136 = arith.constant 0 : index
    %c0_137 = arith.constant 0 : index
    %313 = vector.load %arg11[%c0_135, %c0_136, %c0_137] : memref<1x16x32xf32, #tpu.memory_space<vmem>>, vector<1x16x32xf32>
    tpu.vector_store %arg11[%c0_135, %c0_136, %c0_137], %312 {strides = array<i32>} : memref<1x16x32xf32, #tpu.memory_space<vmem>>, vector<1x16x32xf32>,
    %c0_138 = arith.constant 0 : index
    %c0_139 = arith.constant 0 : index
    %c0_140 = arith.constant 0 : index
    %314 = vector.load %arg11[%c0_138, %c0_139, %c0_140] : memref<1x16x32xf32, #tpu.memory_space<vmem>>, vector<1x4x32xf32>
    %c0_141 = arith.constant 0 : index
    %c0_142 = arith.constant 0 : index
    %c0_143 = arith.constant 0 : index
    %315 = vector.load %arg10[%c0_141, %c0_142, %c0_143] : memref<1x32x32xf32, #tpu.memory_space<vmem>>, vector<1x4x32xf32>
    tpu.vector_store %arg10[%c0_141, %c0_142, %c0_143], %314 {strides = array<i32>} : memref<1x32x32xf32, #tpu.memory_space<vmem>>, vector<1x4x32xf32>,
    %c0_144 = arith.constant 0 : index
    %c4_145 = arith.constant 4 : index
    %c0_146 = arith.constant 0 : index
    %316 = vector.load %arg11[%c0_144, %c4_145, %c0_146] : memref<1x16x32xf32, #tpu.memory_space<vmem>>, vector<1x4x32xf32>
    %c0_147 = arith.constant 0 : index
    %c8_148 = arith.constant 8 : index
    %c0_149 = arith.constant 0 : index
    %317 = vector.load %arg10[%c0_147, %c8_148, %c0_149] : memref<1x32x32xf32, #tpu.memory_space<vmem>>, vector<1x4x32xf32>
    tpu.vector_store %arg10[%c0_147, %c8_148, %c0_149], %316 {strides = array<i32>} : memref<1x32x32xf32, #tpu.memory_space<vmem>>, vector<1x4x32xf32>,
    %c0_150 = arith.constant 0 : index
    %c8_151 = arith.constant 8 : index
    %c0_152 = arith.constant 0 : index
    %318 = vector.load %arg11[%c0_150, %c8_151, %c0_152] : memref<1x16x32xf32, #tpu.memory_space<vmem>>, vector<1x4x32xf32>
    %c0_153 = arith.constant 0 : index
    %c16_154 = arith.constant 16 : index
    %c0_155 = arith.constant 0 : index
    %319 = vector.load %arg10[%c0_153, %c16_154, %c0_155] : memref<1x32x32xf32, #tpu.memory_space<vmem>>, vector<1x4x32xf32>
    tpu.vector_store %arg10[%c0_153, %c16_154, %c0_155], %318 {strides = array<i32>} : memref<1x32x32xf32, #tpu.memory_space<vmem>>, vector<1x4x32xf32>,
    %c0_156 = arith.constant 0 : index
    %c12_157 = arith.constant 12 : index
    %c0_158 = arith.constant 0 : index
    %320 = vector.load %arg11[%c0_156, %c12_157, %c0_158] : memref<1x16x32xf32, #tpu.memory_space<vmem>>, vector<1x4x32xf32>
    %c0_159 = arith.constant 0 : index
    %c24_160 = arith.constant 24 : index
    %c0_161 = arith.constant 0 : index
    %321 = vector.load %arg10[%c0_159, %c24_160, %c0_161] : memref<1x32x32xf32, #tpu.memory_space<vmem>>, vector<1x4x32xf32>
    tpu.vector_store %arg10[%c0_159, %c24_160, %c0_161], %320 {strides = array<i32>} : memref<1x32x32xf32, #tpu.memory_space<vmem>>, vector<1x4x32xf32>,
    return
  }
  func.func @transform_0(%arg0: i32) -> (i32, i32, i32) {
    %c0_i32 = arith.constant 0 : i32
    %c0_i32_0 = arith.constant 0 : i32
    %c0_i32_1 = arith.constant 0 : i32
    return %arg0, %c0_i32, %c0_i32_0 : i32, i32, i32
  }
  func.func @transform_1(%arg0: i32) -> (i32, i32, i32) {
    %c0_i32 = arith.constant 0 : i32
    %c0_i32_0 = arith.constant 0 : i32
    %c0_i32_1 = arith.constant 0 : i32
    %c0_i32_2 = arith.constant 0 : i32
    return %c0_i32, %c0_i32_0, %c0_i32_1 : i32, i32, i32
  }
  func.func @transform_2(%arg0: i32) -> (i32, i32, i32) {
    %c0_i32 = arith.constant 0 : i32
    %c0_i32_0 = arith.constant 0 : i32
    %c0_i32_1 = arith.constant 0 : i32
    %c0_i32_2 = arith.constant 0 : i32
    return %c0_i32, %c0_i32_0, %c0_i32_1 : i32, i32, i32
  }
  func.func @transform_3(%arg0: i32) -> (i32, i32, i32) {
    %c0_i32 = arith.constant 0 : i32
    %c0_i32_0 = arith.constant 0 : i32
    %c0_i32_1 = arith.constant 0 : i32
    %c0_i32_2 = arith.constant 0 : i32
    return %c0_i32, %c0_i32_0, %c0_i32_1 : i32, i32, i32
  }
  func.func @transform_4(%arg0: i32) -> (i32, i32, i32) {
    %c0_i32 = arith.constant 0 : i32
    %c0_i32_0 = arith.constant 0 : i32
    %c0_i32_1 = arith.constant 0 : i32
    %c0_i32_2 = arith.constant 0 : i32
    return %c0_i32, %c0_i32_0, %c0_i32_1 : i32, i32, i32
  }
  func.func @transform_5(%arg0: i32) -> (i32, i32, i32) {
    %c0_i32 = arith.constant 0 : i32
    %c0_i32_0 = arith.constant 0 : i32
    %c0_i32_1 = arith.constant 0 : i32
    %c0_i32_2 = arith.constant 0 : i32
    return %c0_i32, %c0_i32_0, %c0_i32_1 : i32, i32, i32
  }
  func.func @transform_6(%arg0: i32) -> (i32, i32, i32) {
    %c0_i32 = arith.constant 0 : i32
    %c0_i32_0 = arith.constant 0 : i32
    %c0_i32_1 = arith.constant 0 : i32
    %c0_i32_2 = arith.constant 0 : i32
    return %c0_i32, %c0_i32_0, %c0_i32_1 : i32, i32, i32
  }
  func.func @transform_7(%arg0: i32) -> (i32, i32, i32) {
    %c0_i32 = arith.constant 0 : i32
    %c0_i32_0 = arith.constant 0 : i32
    %c0_i32_1 = arith.constant 0 : i32
    %c0_i32_2 = arith.constant 0 : i32
    return %c0_i32, %c0_i32_0, %c0_i32_1 : i32, i32, i32
  }
  func.func @transform_8(%arg0: i32) -> (i32, i32, i32) {
    %c0_i32 = arith.constant 0 : i32
    %c0_i32_0 = arith.constant 0 : i32
    %c0_i32_1 = arith.constant 0 : i32
    %c0_i32_2 = arith.constant 0 : i32
    return %c0_i32, %c0_i32_0, %c0_i32_1 : i32, i32, i32
  }
  func.func @transform_9(%arg0: i32) -> (i32, i32, i32) {
    %c0_i32 = arith.constant 0 : i32
    %c0_i32_0 = arith.constant 0 : i32
    %c0_i32_1 = arith.constant 0 : i32
    return %arg0, %c0_i32, %c0_i32_0 : i32, i32, i32
  }
}

</mosaic_0001>

<bundles_post_ra>
// kernel: h_tblock.1
= control target key start
LH: loop header
LB: loop body
LE: loop exit
PB: predicated region body
PF: predicated region fallthrough
CT: control target
= control target key end

     0   :  { %14 = vsyncpa [#allocation4], 0  ;;  %s4197_s0 = inlined_call_operand.vmem [shape: f32[2,32,32], index: 0, kind: input, shape index: {}]   ;;  %s4198_s1 = inlined_call_operand.vmem [shape: bf16[2,32,32], index: 1, kind: input, shape index: {}]   ;;  %s4199_s2 = inlined_call_operand.vmem [shape: bf16[2,32,32], index: 2, kind: input, shape index: {}]   ;;  %s4200_s3 = inlined_call_operand.vmem [shape: bf16[2,32,32], index: 3, kind: input, shape index: {}]   ;;  %s4201_s4 = inlined_call_operand.vmem [shape: bf16[2,32,32], index: 4, kind: input, shape index: {}]   ;;  %s4202_s5 = inlined_call_operand.vmem [shape: bf16[2,32,64], index: 5, kind: input, shape index: {}]   ;;  %s4203_s6 = inlined_call_operand.vmem [shape: bf16[2,64,32], index: 6, kind: input, shape index: {}]   ;;  %s4204_s7 = inlined_call_operand.vmem [shape: f32[2,6,32], index: 7, kind: input, shape index: {}]   ;;  %s4205_s8 = inlined_call_operand.vmem [shape: f32[2,1,64], index: 8, kind: input, shape index: {}]   ;;  %s4206_s9 = inlined_call_operand.hbm [shape: f32[2,32,32], index: 9, kind: output, shape index: {}]  }
   0x1   :  { %16 = vsyncpa [#allocation4 + $0x1], 0  ;;  %s3567_s30 = smov 0   ;;  %s3569_s10 = smov 0  }
   0x2   :  { %s3571_s11 = smov 0   ;;  %s3573_s12 = smov 0  }
   0x3 LB: > { %s3588_s13 = sadd.s32 4294967295, %s3509_s12   ;;  %s2826_s14 = sadd.s32 4294967294, %s3509_s12   ;;  %s3509_s12 = sphi %s3573_s12, %s4212_s12   ;;  %s3505_s11 = sphi %s3571_s11, %s4211_s11   ;;  %s3501_s10 = sphi %s3569_s10, %s4210_s10   ;;  %s3497_s30 = sphi %s3567_s30, %s4209_s30  }
   0x4   : > { %s3592_s15 = sadd.s32 1, %s3509_s12   ;;  %s223_s16 = sadd.s32 1, %s3505_s11 }
   0x5   : > { %s220_s17 = ssub.s32 %s3509_s12, %s3592_s15  ;;  %p233_p0 = scmp.ne.s32.totalorder %s3505_s11, %s3501_s10 }
   0x6   : > { %p221_p1 = scmp.eq.s32.totalorder %s220_s17, 0  ;;  %p234_p2 = scmp.eq.s32.totalorder %s3588_s13, 1 }
   0x7   : > { %p239_p3 = scmp.ne.s32.totalorder %s3501_s10, %s3497_s30  ;;  %p240_p4 = scmp.eq.s32.totalorder %s2826_s14, 1 }
   0x8   : > { %s3603_s18 = scalar_select %p221_p1, %s3505_s11, %s223_s16  }
   0x9   : > { %p3605_p5 = por %p234_p2, %p233_p0  ;;  %p3609_p6 = por %p240_p4, %p239_p3 }
   0xa   : > { %p2829_p7 = scmp.ge.s32.totalorder %s3509_s12, 1  ;;  %p290_p8 = scmp.lt.s32.totalorder %s3509_s12, 3 }
   0xc   : > { %p291_p9 = pnand %p2829_p7, %p290_p8 }
   0xd   : > { %p326_p10 = scmp.lt.s32.totalorder (!%p291_p9), %s3588_s13, 1  ;;  %vm366_vm0 = vcmask (!%p291_p9), 261120   ;;  %v3334_v28 = vld [vmem:[%s4198_s1] sm:$0xff] (!%p291_p9)   ;;  %v3336_v30 = vld [vmem:[%s4198_s1 + $0x8] sm:$0xff] (!%p291_p9)   ;;  %v420_v38 = vlaneseq (!%p291_p9)  ;;  %vm3512_vm1 = vmmov (!%p291_p9), 0   ;;  %vm667_vm2 = vcmask (!%p291_p9), 130048  }
   0xe   : > { %294 = sbr.rel (%p291_p9) target bundleno = 5439 (0x153f), region = 56  ;;  %v3335_v29 = vld [vmem:[%s4200_s3] sm:$0xff] (!%p291_p9)   ;;  %3054 = vmatprep.subr.bf16.mxu1 (!%p291_p9), %v3334_v28  ;;  %v3337_v31 = vld [vmem:[%s4200_s3 + $0x8] sm:$0xff] (!%p291_p9)   ;;  %vm904_vm3 = vcmask (!%p291_p9), 1043456   ;;  %vm852_vm4 = vcmask (!%p291_p9), 64512   ;;  %s3513_s28 = smov (!%p291_p9), 112  }
   0xf   : > { %3070 = vmatprep.subr.bf16.mxu0 (!%p291_p9), %v3335_v29  ;;  %3055 = vmatpush3.bf16.msra.mxu1 (!%p291_p9), %v3334_v28  ;;  %v3338_v32 = vld [vmem:[%s4199_s2] sm:$0xff] (!%p291_p9)   ;;  %v3659_v44 = vshrl.u32 (!%p291_p9), %v420_v38, 7  ;;  %vm1869_vm5 = vcmask (!%p291_p9), 523264   ;;  %s323_s24 = sand.u32 (!%p291_p9), 1, %s3501_s10   ;;  %vm1942_vm6 = vcmask (!%p291_p9), 257024   ;;  %s3514_s27 = smov (!%p291_p9), [#allocation3]  }
  0x10   : > { %3071 = vmatpush3.bf16.msra.mxu0 (!%p291_p9), %v3335_v29  ;;  %3056 = vmatprep.subr.bf16.mxu1 (!%p291_p9), %v3336_v30  ;;  %v3665_v48 = vld [vmem:[%s4204_s7] sm:$0x3f] (!%p291_p9)  ;;  %s3451_s14 = sshll.u32 (!%p291_p9), %s3514_s27, 4  ;;  %s3452_s14 = int_to_ptr.vmem [resolvable:$false] %s3451_s14 }
  0x11   : > { %3072 = vmatprep.subr.bf16.mxu0 (!%p291_p9), %v3337_v31  ;;  %v422_v47 = vsub.s32 (!%p291_p9), 0, %v3659_v44  ;;  %v430_v52 = vsub.s32 (!%p291_p9), 1, %v3659_v44  ;;  %s3453_s16 = scalar_lea.vmem (!%p291_p9), %s3452_s14, 1024 }
  0x13   : > { %3057 = vmatpush3.bf16.msra.mxu1 (!%p291_p9), %v3336_v30  ;;  %v423_v51 = vrot.slane (!%p291_p9), %v3665_v48, %v422_v47  ;;  %v431_v57 = vrot.slane (!%p291_p9), %v3665_v48, %v430_v52 }
  0x14   : > { %3073 = vmatpush3.bf16.msra.mxu0 (!%p291_p9), %v3337_v31  ;;  %3062 = vmatprep.subr.bf16.mxu1 (!%p291_p9), %v3338_v32 }
  0x15   : > { %s327_s21 = scalar_select %p326_p10, %s3588_s13, 1 }
  0x17   : > { %s2951_s22 = sshll.u32 %s327_s21, 5  ;;  %s2964_s21 = sshll.u32 %s3588_s13, 9 }
  0x18   : > { %s330_s25 = scalar_lea.vmem %s4197_s0, %s2951_s22  ;;  %s4156_s13 = scalar_lea.sflag [#allocation4], %s323_s24 }
  0x19   : > { %v3620_v0 = vld [vmem:[%s330_s25] sm:$0xff]  ;;  %v3622_v1 = vld [vmem:[%s330_s25 + $0x10] sm:$0xff]  ;;  %v3624_v2 = vld [vmem:[%s330_s25 + $0x8] sm:$0xff] }
  0x1a   : > { %v367_v3 = vsel %vm366_vm0, %v3620_v0, 0.0  ;;  %v373_v4 = vsel %vm366_vm0, %v3622_v1, 0.0  ;;  %v3630_v5 = vld [vmem:[%s330_s25 + $0x18] sm:$0xff]  ;;  %v370_v6 = vsel %vm366_vm0, %v3624_v2, 0.0  ;;  %s2830_s25 = sshll.u32 %s323_s24, 5 }
  0x1b   : > { %368 = vadd.xlane.f32.xlu0 %v367_v3  ;;  %374 = vadd.xlane.f32.xlu1 %v373_v4  ;;  %v376_v7 = vsel %vm366_vm0, %v3630_v5, 0.0  ;;  %s3959_s29 = scalar_lea.vmem [#allocation3], %s2830_s25 }
  0x1c   : > { %s2764_s22 = sshll.u32 %s3959_s29, 4  ;;  %s4144_s22 = int_to_ptr.vmem [resolvable:$true] %s2764_s22 }
  0x1d   : > { %s3447_s26 = scalar_lea.vmem %s4144_s22, 512  ;;  %p3454_p0 = scmp.lt.s32.totalorder %s4144_s22, %s3452_s14 }
  0x1e   : > { %p3448_p11 = scmp.ne.s32.totalorder %s4144_s22, %s3447_s26  ;;  %p3455_p1 = scmp.lt.s32.totalorder %s3453_s16, %s3447_s26 }
  0x1f   : > { %371 = vadd.xlane.f32.xlu0 %v370_v6  ;;  %377 = vadd.xlane.f32.xlu1 %v376_v7 }
  0x20   : > { %p3449_p12 = pnand %p3448_p11, %p3605_p5  ;;  %p3456_p2 = por %p3455_p1, %p3454_p0 }
  0x22   : > { %p3450_p13 = pneg %p3449_p12 }
  0x24   : > { %p3457_p3 = pnand %p3456_p2, %p3450_p13 }
  0xa8   : > { %v369_v8 = vpop.xlane.xlu0 %368  ;;  %v375_v9 = vpop.xlane.xlu1 %374 }
  0xa9   : > { %v380_v10 = vmul.f32 0.03125, %v369_v8  ;;  %v382_v11 = vmul.f32 0.03125, %v375_v9 }
  0xab   : > { %v384_v12 = vsub.f32 %v3620_v0, %v380_v10  ;;  %v386_v13 = vsub.f32 %v3622_v1, %v382_v11  ;;  %v3339_v10 = vld [vmem:[%s4199_s2 + $0x8] sm:$0xff]   ;;  %v3511_v11 = vmov 0.0  }
  0xac   : > { %v372_v14 = vpop.xlane.xlu0 %371  ;;  %v378_v15 = vpop.xlane.xlu1 %377  ;;  %3084 = vmatprep.subr.bf16.mxu0 %v3511_v11 }
  0xad   : > { %v381_v16 = vmul.f32 0.03125, %v372_v14  ;;  %v383_v17 = vmul.f32 0.03125, %v378_v15  ;;  %v388_v18 = vmul.f32 %v384_v12, %v384_v12  ;;  %v390_v19 = vmul.f32 %v386_v13, %v386_v13 }
  0xaf   : > { %v385_v20 = vsub.f32 %v3624_v2, %v381_v16  ;;  %v387_v21 = vsub.f32 %v3630_v5, %v383_v17  ;;  %v392_v22 = vsel %vm366_vm0, %v388_v18, 0.0  ;;  %v398_v23 = vsel %vm366_vm0, %v390_v19, 0.0 }
  0xb0   : > { %393 = vadd.xlane.f32.xlu0 %v392_v22 }
  0xb1   : > { %v389_v24 = vmul.f32 %v385_v20, %v385_v20  ;;  %v391_v25 = vmul.f32 %v387_v21, %v387_v21 }
  0xb3   : > { %v395_v26 = vsel %vm366_vm0, %v389_v24, 0.0  ;;  %v401_v27 = vsel %vm366_vm0, %v391_v25, 0.0 }
  0xb4   : > { %399 = vadd.xlane.f32.xlu0 %v398_v23  ;;  %396 = vadd.xlane.f32.xlu1 %v395_v26 }
  0xb8   : > { %402 = vadd.xlane.f32.xlu1 %v401_v27 }
 0x13d   : > { %v394_v33 = vpop.xlane.xlu0 %393 }
 0x13e   : > { %v404_v34 = vmul.f32 0.03125, %v394_v33 }
 0x140   : > { %v408_v35 = vadd.f32 1e-05, %v404_v34 }
 0x141   : > { %v397_v36 = vpop.xlane.xlu1 %396  ;;  %v400_v37 = vpop.xlane.xlu0 %399 }
 0x142   : > { %3362 = vrsqrt.f32 %v408_v35  ;;  %v405_v39 = vmul.f32 0.03125, %v397_v36  ;;  %v406_v40 = vmul.f32 0.03125, %v400_v37 }
 0x144   : > { %v409_v41 = vadd.f32 1e-05, %v405_v39  ;;  %v410_v42 = vadd.f32 1e-05, %v406_v40 }
 0x145   : > { %v403_v43 = vpop.xlane.xlu1 %402 }
 0x146   : > { %3364 = vrsqrt.f32 %v409_v41  ;;  %v407_v45 = vmul.f32 0.03125, %v403_v43 }
 0x147   : > { %3366 = vrsqrt.f32 %v410_v42 }
 0x148   : > { %v411_v46 = vadd.f32 1e-05, %v407_v45 }
 0x14a   : > { %3368 = vrsqrt.f32 %v411_v46 }
 0x14c   : > { %v3363_v49 = vpop.eup %3362 }
 0x14d   : > { %v416_v50 = vmul.f32 %v3363_v49, %v384_v12 }
 0x14f   : > { %v424_v56 = vmul.f32 %v423_v51, %v416_v50 }
 0x150   : > { %v3365_v53 = vpop.eup %3364 }
 0x151   : > { %v3367_v54 = vpop.eup %3366  ;;  %v417_v55 = vmul.f32 %v3365_v53, %v385_v20  ;;  %v432_v62 = vadd.f32 %v431_v57, %v424_v56 }
 0x152   : > { %v418_v58 = vmul.f32 %v3367_v54, %v386_v13 }
 0x153   : > { %v425_v59 = vmul.f32 %v423_v51, %v417_v55 }
 0x154   : > { %v3369_v60 = vpop.eup %3368  ;;  %v426_v3 = vmul.f32 %v423_v51, %v418_v58 }
 0x155   : > { %v419_v61 = vmul.f32 %v3369_v60, %v387_v21  ;;  %v433_v63 = vadd.f32 %v431_v57, %v425_v59 }
 0x156   : > { %v434_v7 = vadd.f32 %v431_v57, %v426_v3 }
 0x157   : > { %v436_v4 = vpack.c.bf16 %v433_v63, %v432_v62  ;;  %v427_v6 = vmul.f32 %v423_v51, %v419_v61 }
 0x159   : > { %3058 = vmatprep.mubr.msk.bf16.mxu1 %vm366_vm0, %v436_v4  ;;  %3074 = vmatprep.mubr.msk.bf16.mxu0 %vm366_vm0, %v436_v4  ;;  %v435_v8 = vadd.f32 %v431_v57, %v427_v6 }
 0x15b   : > { %v437_v9 = vpack.c.bf16 %v435_v8, %v434_v7 }
 0x15d   : > { %3059 = vmatmul.mubr.msk.bf16.vlgmr.msra.gmra.mrb[0].mxu1 %vm366_vm0, %v437_v9  ;;  %3075 = vmatmul.mubr.msk.bf16.vlgmr.msra.gmra.mrb[0].mxu0 %vm366_vm0, %v437_v9 }
 0x15e   : > { %3063 = vmatpush3.bf16.msra.mxu1 %v3338_v32  ;;  %3066 = vmatprep.mubr.msk.bf16.mxu1 %vm366_vm0, %v436_v4 }
 0x15f   : > { %3064 = vmatprep.subr.bf16.mxu1 %v3339_v10  ;;  %3086 = vmatprep.mubr.msk.bf16.mxu0 %vm3512_vm1, %v3511_v11 }
 0x162   : > { %3065 = vmatpush3.bf16.msra.mxu1 %v3339_v10 }
 0x163   : > { %3078 = vmatprep.subr.bf16.mxu1 %v3511_v11 }
 0x165   : > { %3067 = vmatmul.mubr.msk.bf16.vlgmr.msra.gmra.mrb[4].mxu1 %vm366_vm0, %v437_v9 }
 0x166   : > { %3080 = vmatprep.mubr.msk.bf16.mxu1 %vm3512_vm1, %v3511_v11 }
 0x230   : > { %v3060_v12 = vpop.f32.mrb[0].mxu1  ;;  %v3689_v13 = vpop.f32.mrb[0].mxu0 }
 0x231   : > { %v490_v14 = vpop.f32.mrb[1].mxu1  ;;  %v620_v15 = vpop.f32.mrb[1].mxu0  ;;  %v507_v35 = vmul.f32 0.25, %v3060_v12 }
 0x232   : > { %v3061_v16 = vpop.f32.mrb[2].mxu1  ;;  %v3691_v17 = vpop.f32.mrb[2].mxu0  ;;  %v505_v27 = vmul.f32 0.25, %v490_v14  ;;  %v3724_v37 = vpack.c.bf16 %v620_v15, %v620_v15 }
 0x233   : > { %v493_v18 = vpop.f32.mrb[3].mxu1  ;;  %v623_v19 = vpop.f32.mrb[3].mxu0  ;;  %v508_v38 = vmul.f32 0.25, %v3061_v16  ;;  %v3727_v39 = vpack.c.bf16 %v507_v35, %v507_v35 }
 0x234   : > { %v506_v29 = vmul.f32 0.25, %v493_v18  ;;  %v3705_v31 = vpack.c.bf16 %v505_v27, %v505_v27  ;;  %v3729_v40 = vpack.c.bf16 %v623_v19, %v623_v19  ;;  %v906_v41 = vsel %vm904_vm3, %v3724_v37, 0 }
 0x235   : > { %v3733_v42 = vpack.c.bf16 %v508_v38, %v508_v38  ;;  %v3773_v38 = vpack.c.bf16 %v3689_v13, %v3689_v13 }
 0x236   : > { %v3709_v33 = vpack.c.bf16 %v506_v29, %v506_v29  ;;  %v952_v43 = vsel %vm904_vm3, %v3729_v40, 0 }
 0x238   : > { %v3068_v20 = vpop.f32.mrb[4].mxu1 }
 0x239   : > { %v557_v21 = vpop.f32.mrb[5].mxu1  ;;  %v3702_v30 = vpack.c.bf16 %v3068_v20, %v3068_v20 }
 0x23a   : > { %v3693_v22 = vpack.c.bf16 %v557_v21, %v557_v21  ;;  %v3069_v23 = vpop.f32.mrb[6].mxu1 }
 0x23b   : > { %v560_v24 = vpop.f32.mrb[7].mxu1  ;;  %v3707_v32 = vpack.c.bf16 %v3069_v23, %v3069_v23  ;;  %v764_v34 = vsel %vm667_vm2, %v3702_v30, 0 }
 0x23c   : > { %v672_v25 = vsel %vm667_vm2, %v3693_v22, 0  ;;  %v3697_v26 = vpack.c.bf16 %v560_v24, %v560_v24 }
 0x23d   : > { %3079 = vmatpush3.bf16.xpose.msra.mxu1 %v672_v25  ;;  %v810_v36 = vsel %vm667_vm2, %v3707_v32, 0 }
 0x23e   : > { %v718_v28 = vsel %vm667_vm2, %v3697_v26, 0  ;;  %3090 = vmatprep.subr.bf16.mxu1 %v3511_v11 }
 0x23f   : > { %3085 = vmatpush3.bf16.xpose.msra.mxu0 %v718_v28 }
 0x240   : > { %3096 = vmatprep.subr.bf16.mxu0 %v3511_v11 }
 0x244   : > { %3081 = vmatmul.mubr.msk.bf16.vlgmr.msra.gmra.mrb[8].mxu1 %vm667_vm2, %v3705_v31 }
 0x245   : > { %3091 = vmatpush3.bf16.xpose.msra.mxu1 %v764_v34  ;;  %3092 = vmatprep.mubr.msk.bf16.mxu1 %vm3512_vm1, %v3511_v11 }
 0x246   : > { %3087 = vmatmul.mubr.msk.bf16.vlgmr.msra.gmra.mrb[4].mxu0 %vm667_vm2, %v3709_v33  ;;  %3102 = vmatprep.subr.bf16.mxu1 %v3511_v11 }
 0x247   : > { %3097 = vmatpush3.bf16.xpose.msra.mxu0 %v810_v36  ;;  %3098 = vmatprep.mubr.msk.bf16.mxu0 %vm3512_vm1, %v3511_v11 }
 0x248   : > { %3108 = vmatprep.subr.bf16.mxu0 %v3511_v11 }
 0x24c   : > { %3093 = vmatmul.mubr.msk.bf16.vlgmr.msra.gmra.mrb[12].mxu1 %vm667_vm2, %v3727_v39 }
 0x24d   : > { %3103 = vmatpush3.bf16.msra.mxu1 %v906_v41  ;;  %3104 = vmatprep.mubr.msk.bf16.mxu1 %vm3512_vm1, %v3511_v11 }
 0x24e   : > { %3099 = vmatmul.mubr.msk.bf16.vlgmr.msra.gmra.mrb[8].mxu0 %vm667_vm2, %v3733_v42  ;;  %3114 = vmatprep.subr.bf16.mxu1 %v3511_v11 }
 0x24f   : > { %3109 = vmatpush3.bf16.msra.mxu0 %v952_v43  ;;  %3110 = vmatprep.mubr.msk.bf16.mxu0 %vm3512_vm1, %v3511_v11 }
 0x250   : > { %3120 = vmatprep.subr.bf16.mxu0 %v3511_v11 }
 0x317   : > { %v708_v45 = vpop.f32.mrb[8].mxu1 }
 0x318   : > { %v3082_v46 = vpop.f32.mrb[9].mxu1  ;;  %v853_v49 = vsel %vm852_vm4, %v708_v45, -inf }
 0x319   : > { %854 = vmax.xlane.f32.xlu0 %v853_v49  ;;  %v711_v50 = vpop.f32.mrb[10].mxu1  ;;  %v754_v51 = vpop.f32.mrb[4].mxu0 }
 0x31a   : > { %v3083_v53 = vpop.f32.mrb[11].mxu1  ;;  %v3088_v54 = vpop.f32.mrb[5].mxu0  ;;  %v856_v55 = vsel %vm852_vm4, %v754_v51, -inf }
 0x31b   : > { %857 = vmax.xlane.f32.xlu1 %v856_v55  ;;  %v757_v56 = vpop.f32.mrb[6].mxu0 }
 0x31c   : > { %v3089_v57 = vpop.f32.mrb[7].mxu0 }
 0x31f   : > { %v800_v58 = vpop.f32.mrb[12].mxu1 }
 0x320   : > { %v3094_v59 = vpop.f32.mrb[13].mxu1  ;;  %v859_v60 = vsel %vm852_vm4, %v800_v58, -inf }
 0x321   : > { %860 = vmax.xlane.f32.xlu0 %v859_v60  ;;  %v803_v61 = vpop.f32.mrb[14].mxu1  ;;  %v846_v62 = vpop.f32.mrb[8].mxu0 }
 0x322   : > { %v3095_v63 = vpop.f32.mrb[15].mxu1  ;;  %v3100_v3 = vpop.f32.mrb[9].mxu0  ;;  %v862_v4 = vsel %vm852_vm4, %v846_v62, -inf }
 0x323   : > { %863 = vmax.xlane.f32.xlu1 %v862_v4  ;;  %v849_v6 = vpop.f32.mrb[10].mxu0 }
 0x324   : > { %v3101_v7 = vpop.f32.mrb[11].mxu0 }
 0x3a6   : > { %v855_v8 = vpop.xlane.xlu0 %854 }
 0x3a7   : > { %v865_v9 = vsub.f32 %v708_v45, %v855_v8 }
 0x3a8   : > { %v858_v10 = vpop.xlane.xlu1 %857 }
 0x3a9   : > { %v869_v12 = vmul.f32 1.442695, %v865_v9  ;;  %v866_v14 = vsub.f32 %v754_v51, %v858_v10 }
 0x3ab   : > { %3370 = vpow2.f32 %v869_v12  ;;  %v871_v15 = vmul.f32 1.442695, %v866_v14 }
 0x3ad   : > { %3372 = vpow2.f32 %v871_v15 }
 0x3ae   : > { %v861_v16 = vpop.xlane.xlu0 %860 }
 0x3af   : > { %v867_v18 = vsub.f32 %v800_v58, %v861_v16 }
 0x3b0   : > { %v864_v28 = vpop.xlane.xlu1 %863 }
 0x3b1   : > { %v873_v19 = vmul.f32 1.442695, %v867_v18  ;;  %v868_v29 = vsub.f32 %v846_v62, %v864_v28 }
 0x3b3   : > { %3374 = vpow2.f32 %v873_v19  ;;  %v875_v34 = vmul.f32 1.442695, %v868_v29 }
 0x3b5   : > { %v3371_v20 = vpop.eup %3370  ;;  %3376 = vpow2.f32 %v875_v34 }
 0x3b6   : > { %v877_v21 = vsel %vm852_vm4, %v3371_v20, 0.0 }
 0x3b7   : > { %v3373_v23 = vpop.eup %3372  ;;  %878 = vadd.xlane.f32.xlu0 %v877_v21 }
 0x3b8   : > { %v880_v24 = vsel %vm852_vm4, %v3373_v23, 0.0 }
 0x3b9   : > { %881 = vadd.xlane.f32.xlu1 %v880_v24 }
 0x3bd   : > { %v3375_v25 = vpop.eup %3374 }
 0x3be   : > { %v883_v27 = vsel %vm852_vm4, %v3375_v25, 0.0 }
 0x3bf   : > { %884 = vadd.xlane.f32.xlu0 %v883_v27  ;;  %v3377_v35 = vpop.eup %3376 }
 0x3c0   : > { %v886_v36 = vsel %vm852_vm4, %v3377_v35, 0.0 }
 0x3ca   : > { %1140 = vrot.lane.b32.xlu1 %v3697_v26, %s3513_s28 }
 0x3ce   : > { %1088 = vrot.lane.b32.xlu1 %v3705_v31, %s3513_s28 }
 0x3d5   : > { %1090 = vrot.lane.b32.xlu0 %v3693_v22, %s3513_s28 }
 0x3d9   : > { %1190 = vrot.lane.b32.xlu0 %v3702_v30, %s3513_s28 }
 0x3dd   : > { %1188 = vrot.lane.b32.xlu0 %v3727_v39, %s3513_s28 }
 0x3f2   : > { %887 = vadd.xlane.f32.xlu1 %v886_v36 }
 0x403   : > { %1138 = vrot.lane.b32.xlu1 %v3709_v33, %s3513_s28  ;;  %v3777_v33 = vpack.c.bf16 %v3691_v17, %v3691_v17 }
 0x405   : > { %v1044_v13 = vsel %vm904_vm3, %v3777_v33, 0 }
 0x407   : > { %1240 = vrot.lane.b32.xlu1 %v3707_v32, %s3513_s28 }
 0x40b   : > { %1238 = vrot.lane.b32.xlu1 %v3733_v42, %s3513_s28  ;;  %v998_v42 = vsel %vm904_vm3, %v3773_v38, 0 }
 0x444   : > { %v879_v22 = vpop.xlane.xlu0 %878 }
 0x445   : > { %3378 = vrcp.f32 %v879_v22 }
 0x446   : > { %v882_v26 = vpop.xlane.xlu1 %881 }
 0x447   : > { %3380 = vrcp.f32 %v882_v26 }
 0x44a   : > { %v1141_v53 = vpop.permute.xlu1 %1140 }
 0x44b   : > { %v1146_v63 = vsel %vm667_vm2, %v1141_v53, 0 }
 0x44c   : > { %v885_v30 = vpop.xlane.xlu0 %884 }
 0x44d   : > { %3382 = vrcp.f32 %v885_v30 }
 0x44e   : > { %v1089_v55 = vpop.permute.xlu1 %1088 }
 0x44f   : > { %v3379_v31 = vpop.eup %3378 }
 0x450   : > { %v893_v39 = vmul.f32 %v3379_v31, %v3371_v20  ;;  %v1091_v49 = vpop.permute.xlu0 %1090 }
 0x451   : > { %v3381_v41 = vpop.eup %3380  ;;  %v1096_v51 = vsel %vm667_vm2, %v1091_v49, 0 }
 0x452   : > { %v894_v32 = vmul.f32 %v3381_v41, %v3373_v23  ;;  %v897_v43 = vpack.c.bf16 %v893_v39, %v893_v39 }
 0x454   : > { %3105 = vmatmul.mubr.msk.bf16.vlgmr.msra.gmra.mrb[16].mxu1 %vm852_vm4, %v897_v43  ;;  %v898_v45 = vpack.c.bf16 %v894_v32, %v894_v32  ;;  %v1191_v54 = vpop.permute.xlu0 %1190 }
 0x455   : > { %3115 = vmatpush3.bf16.msra.mxu1 %v998_v42  ;;  %3116 = vmatprep.mubr.msk.bf16.mxu1 %vm3512_vm1, %v3511_v11  ;;  %v1196_v56 = vsel %vm667_vm2, %v1191_v54, 0 }
 0x456   : > { %3111 = vmatmul.mubr.msk.bf16.vlgmr.msra.gmra.mrb[12].mxu0 %vm852_vm4, %v898_v45  ;;  %3126 = vmatprep.subr.bf16.mxu1 %v3511_v11 }
 0x457   : > { %v3383_v17 = vpop.eup %3382  ;;  %3121 = vmatpush3.bf16.msra.mxu0 %v1044_v13  ;;  %3122 = vmatprep.mubr.msk.bf16.mxu0 %vm3512_vm1, %v3511_v11 }
 0x458   : > { %v895_v46 = vmul.f32 %v3383_v17, %v3375_v25  ;;  %3132 = vmatprep.subr.bf16.mxu0 %v3511_v11  ;;  %v1189_v57 = vpop.permute.xlu0 %1188 }
 0x45a   : > { %v899_v50 = vpack.c.bf16 %v895_v46, %v895_v46 }
 0x45c   : > { %3117 = vmatmul.mubr.msk.bf16.vlgmr.msra.gmra.mrb[20].mxu1 %vm852_vm4, %v899_v50 }
 0x45d   : > { %3128 = vmatprep.mubr.msk.bf16.mxu1 %vm3512_vm1, %v3511_v11 }
 0x45e   : > { %3127 = vmatpush3.bf16.xpose.msra.mxu1 %v1096_v51 }
 0x45f   : > { %3138 = vmatprep.subr.bf16.mxu1 %v3511_v11 }
 0x465   : > { %3129 = vmatmul.mubr.msk.bf16.vlgmr.msra.gmra.mrb[24].mxu1 %vm667_vm2, %v1089_v55 }
 0x466   : > { %3139 = vmatpush3.bf16.xpose.msra.mxu1 %v1196_v56  ;;  %3140 = vmatprep.mubr.msk.bf16.mxu1 %vm3512_vm1, %v3511_v11 }
 0x467   : > { %3150 = vmatprep.subr.bf16.mxu1 %v3511_v11 }
 0x46d   : > { %3141 = vmatmul.mubr.msk.bf16.vlgmr.msra.gmra.mrb[28].mxu1 %vm667_vm2, %v1189_v57 }
 0x46e   : > { %3152 = vmatprep.mubr.msk.bf16.mxu1 %vm3512_vm1, %v3511_v11 }
 0x47f   : > { %v888_v58 = vpop.xlane.xlu1 %887 }
 0x480   : > { %3384 = vrcp.f32 %v888_v58 }
 0x483   : > { %v1139_v62 = vpop.permute.xlu1 %1138 }
 0x487   : > { %v1241_v3 = vpop.permute.xlu1 %1240 }
 0x488   : > { %v1246_v4 = vsel %vm667_vm2, %v1241_v3, 0 }
 0x48a   : > { %v3385_v59 = vpop.eup %3384 }
 0x48b   : > { %v896_v60 = vmul.f32 %v3385_v59, %v3377_v35  ;;  %v1239_v6 = vpop.permute.xlu1 %1238 }
 0x48d   : > { %v900_v61 = vpack.c.bf16 %v896_v60, %v896_v60 }
 0x48f   : > { %3123 = vmatmul.mubr.msk.bf16.vlgmr.msra.gmra.mrb[16].mxu0 %vm852_vm4, %v900_v61 }
 0x490   : > { %3133 = vmatpush3.bf16.xpose.msra.mxu0 %v1146_v63  ;;  %3134 = vmatprep.mubr.msk.bf16.mxu0 %vm3512_vm1, %v3511_v11 }
 0x491   : > { %3144 = vmatprep.subr.bf16.mxu0 %v3511_v11 }
 0x497   : > { %3135 = vmatmul.mubr.msk.bf16.vlgmr.msra.gmra.mrb[20].mxu0 %vm667_vm2, %v1139_v62 }
 0x498   : > { %3145 = vmatpush3.bf16.xpose.msra.mxu0 %v1246_v4  ;;  %3146 = vmatprep.mubr.msk.bf16.mxu0 %vm3512_vm1, %v3511_v11 }
 0x499   : > { %3156 = vmatprep.subr.bf16.mxu0 %v3511_v11 }
 0x49f   : > { %3147 = vmatmul.mubr.msk.bf16.vlgmr.msra.gmra.mrb[24].mxu0 %vm667_vm2, %v1239_v6 }
 0x4a0   : > { %3158 = vmatprep.mubr.msk.bf16.mxu0 %vm3512_vm1, %v3511_v11 }
 0x527   : > { %v3817_v7 = vpop.f32.mrb[16].mxu1 }
 0x528   : > { %v3106_v8 = vpop.f32.mrb[17].mxu1 }
 0x529   : > { %v945_v9 = vpop.f32.mrb[18].mxu1  ;;  %v3819_v10 = vpop.f32.mrb[12].mxu0 }
 0x52a   : > { %v1086_v12 = vpack.c.bf16 %v3819_v10, %v3817_v7  ;;  %v3107_v14 = vpop.f32.mrb[19].mxu1  ;;  %v3112_v15 = vpop.f32.mrb[13].mxu0 }
 0x52b   : > { %v991_v16 = vpop.f32.mrb[14].mxu0 }
 0x52c   : > { %v3113_v18 = vpop.f32.mrb[15].mxu0 }
 0x52f   : > { %v3823_v19 = vpop.f32.mrb[20].mxu1 }
 0x530   : > { %v3118_v20 = vpop.f32.mrb[21].mxu1 }
 0x531   : > { %v1037_v21 = vpop.f32.mrb[22].mxu1 }
 0x532   : > { %v3119_v23 = vpop.f32.mrb[23].mxu1 }
 0x538   : > { %v1132_v24 = vpop.f32.mrb[24].mxu1 }
 0x539   : > { %v3130_v25 = vpop.f32.mrb[25].mxu1  ;;  %v1288_v27 = vsel %vm852_vm4, %v1132_v24, -inf }
 0x53a   : > { %1289 = vmax.xlane.f32.xlu0 %v1288_v27  ;;  %v1135_v28 = vpop.f32.mrb[26].mxu1 }
 0x53b   : > { %v3131_v29 = vpop.f32.mrb[27].mxu1 }
 0x540   : > { %v1232_v34 = vpop.f32.mrb[28].mxu1 }
 0x541   : > { %v3142_v35 = vpop.f32.mrb[29].mxu1  ;;  %v1294_v36 = vsel %vm852_vm4, %v1232_v34, -inf }
 0x542   : > { %1295 = vmax.xlane.f32.xlu0 %v1294_v36  ;;  %v1235_v22 = vpop.f32.mrb[30].mxu1 }
 0x543   : > { %v3143_v26 = vpop.f32.mrb[31].mxu1 }
 0x562   : > { %v3827_v30 = vpop.f32.mrb[16].mxu0 }
 0x563   : > { %v1087_v31 = vpack.c.bf16 %v3827_v30, %v3823_v19  ;;  %v3124_v39 = vpop.f32.mrb[17].mxu0 }
 0x564   : > { %v1083_v41 = vpop.f32.mrb[18].mxu0 }
 0x565   : > { %v3125_v32 = vpop.f32.mrb[19].mxu0 }
 0x56a   : > { %v1182_v43 = vpop.f32.mrb[20].mxu0 }
 0x56b   : > { %v3136_v42 = vpop.f32.mrb[21].mxu0  ;;  %v1291_v45 = vsel %vm852_vm4, %v1182_v43, -inf }
 0x56c   : > { %1292 = vmax.xlane.f32.xlu1 %v1291_v45  ;;  %v1185_v13 = vpop.f32.mrb[22].mxu0 }
 0x56d   : > { %v3137_v17 = vpop.f32.mrb[23].mxu0 }
 0x572   : > { %v1282_v46 = vpop.f32.mrb[24].mxu0 }
 0x573   : > { %v3148_v49 = vpop.f32.mrb[25].mxu0  ;;  %v1297_v50 = vsel %vm852_vm4, %v1282_v46, -inf }
 0x574   : > { %1298 = vmax.xlane.f32.xlu0 %v1297_v50  ;;  %v1285_v51 = vpop.f32.mrb[26].mxu0  ;;  %v3341_v49 = vld [vmem:[%s4201_s4] sm:$0xff]  }
 0x575   : > { %v3149_v53 = vpop.f32.mrb[27].mxu0 }
 0x5c7   : > { %v1290_v54 = vpop.xlane.xlu0 %1289 }
 0x5c8   : > { %v1300_v55 = vsub.f32 %v1132_v24, %v1290_v54 }
 0x5ca   : > { %v1304_v56 = vmul.f32 1.442695, %v1300_v55 }
 0x5cc   : > { %3386 = vpow2.f32 %v1304_v56 }
 0x5cf   : > { %v1296_v57 = vpop.xlane.xlu0 %1295 }
 0x5d0   : > { %v1302_v58 = vsub.f32 %v1232_v34, %v1296_v57 }
 0x5d2   : > { %v1308_v59 = vmul.f32 1.442695, %v1302_v58 }
 0x5d4   : > { %3388 = vpow2.f32 %v1308_v59 }
 0x5d6   : > { %v3387_v60 = vpop.eup %3386 }
 0x5d7   : > { %v1312_v61 = vsel %vm852_vm4, %v3387_v60, 0.0 }
 0x5d8   : > { %1313 = vadd.xlane.f32.xlu0 %v1312_v61 }
 0x5de   : > { %v3389_v62 = vpop.eup %3388 }
 0x5df   : > { %v1318_v63 = vsel %vm852_vm4, %v3389_v62, 0.0 }
 0x5e0   : > { %1319 = vadd.xlane.f32.xlu0 %v1318_v63 }
 0x5f6   : > { %1336 = vrot.lane.b32.xlu0 %v3724_v37, %s3513_s28 }
 0x5f9   : > { %v1293_v3 = vpop.xlane.xlu1 %1292 }
 0x5fa   : > { %v1301_v4 = vsub.f32 %v1182_v43, %v1293_v3 }
 0x5fc   : > { %v1306_v6 = vmul.f32 1.442695, %v1301_v4 }
 0x5fe   : > { %3390 = vpow2.f32 %v1306_v6 }
 0x601   : > { %v1299_v14 = vpop.xlane.xlu0 %1298 }
 0x602   : > { %v1303_v15 = vsub.f32 %v1282_v46, %v1299_v14  ;;  %v3340_v46 = vld [vmem:[%s4201_s4 + $0x8] sm:$0xff]   ;;  %v1658_v14 = vsub.s32 2, %v3659_v44 }
 0x604   : > { %v1310_v16 = vmul.f32 1.442695, %v1303_v15 }
 0x606   : > { %3392 = vpow2.f32 %v1310_v16  ;;  %v1659_v16 = vrot.slane %v3665_v48, %v1658_v14 }
 0x608   : > { %v3391_v8 = vpop.eup %3390 }
 0x609   : > { %v1315_v9 = vsel %vm852_vm4, %v3391_v8, 0.0 }
 0x60a   : > { %1316 = vadd.xlane.f32.xlu1 %v1315_v9 }
 0x610   : > { %v3393_v18 = vpop.eup %3392 }
 0x611   : > { %v1321_v37 = vsel %vm852_vm4, %v3393_v18, 0.0 }
 0x61b   : > { %1384 = vrot.lane.b32.xlu1 %v3729_v40, %s3513_s28 }
 0x61f   : > { %1432 = vrot.lane.b32.xlu1 %v3773_v38, %s3513_s28 }
 0x643   : > { %1322 = vadd.xlane.f32.xlu1 %v1321_v37 }
 0x654   : > { %1480 = vrot.lane.b32.xlu1 %v3777_v33, %s3513_s28 }
 0x665   : > { %v1314_v20 = vpop.xlane.xlu0 %1313 }
 0x666   : > { %3394 = vrcp.f32 %v1314_v20 }
 0x66d   : > { %v1320_v21 = vpop.xlane.xlu0 %1319 }
 0x66e   : > { %3396 = vrcp.f32 %v1320_v21 }
 0x670   : > { %v3395_v23 = vpop.eup %3394 }
 0x671   : > { %v1328_v24 = vmul.f32 %v3395_v23, %v3387_v60  ;;  %v1337_v40 = vpop.permute.xlu0 %1336 }
 0x672   : > { %v1342_v25 = vsel %vm904_vm3, %v1337_v40, 0 }
 0x673   : > { %3151 = vmatpush3.bf16.msra.mxu1 %v1342_v25  ;;  %v1332_v38 = vpack.c.bf16 %v1328_v24, %v1328_v24 }
 0x674   : > { %3162 = vmatprep.subr.bf16.mxu1 %v3511_v11 }
 0x676   : > { %3153 = vmatmul.mubr.msk.bf16.vlgmr.msra.gmra.mrb[32].mxu1 %vm852_vm4, %v1332_v38 }
 0x677   : > { %3164 = vmatprep.mubr.msk.bf16.mxu1 %vm3512_vm1, %v3511_v11 }
 0x678   : > { %v3397_v33 = vpop.eup %3396 }
 0x679   : > { %v1330_v34 = vmul.f32 %v3397_v33, %v3389_v62 }
 0x67b   : > { %v1334_v26 = vpack.c.bf16 %v1330_v34, %v1330_v34 }
 0x697   : > { %v1317_v27 = vpop.xlane.xlu1 %1316 }
 0x698   : > { %3398 = vrcp.f32 %v1317_v27 }
 0x69b   : > { %v1385_v28 = vpop.permute.xlu1 %1384 }
 0x69c   : > { %v1390_v29 = vsel %vm904_vm3, %v1385_v28, 0 }
 0x69d   : > { %3157 = vmatpush3.bf16.msra.mxu0 %v1390_v29 }
 0x69e   : > { %3168 = vmatprep.subr.bf16.mxu0 %v3511_v11 }
 0x69f   : > { %v1433_v35 = vpop.permute.xlu1 %1432 }
 0x6a0   : > { %v1438_v36 = vsel %vm904_vm3, %v1433_v35, 0 }
 0x6a1   : > { %3163 = vmatpush3.bf16.msra.mxu1 %v1438_v36 }
 0x6a2   : > { %v3399_v22 = vpop.eup %3398  ;;  %3174 = vmatprep.subr.bf16.mxu1 %v3340_v46 }
 0x6a3   : > { %v1329_v39 = vmul.f32 %v3399_v22, %v3391_v8 }
 0x6a4   : > { %3165 = vmatmul.mubr.msk.bf16.vlgmr.msra.gmra.mrb[36].mxu1 %vm852_vm4, %v1334_v26 }
 0x6a5   : > { %v1333_v41 = vpack.c.bf16 %v1329_v39, %v1329_v39  ;;  %3175 = vmatpush3.bf16.msra.mxu1 %v3340_v46  ;;  %v3343_v46 = vld [vmem:[%s4202_s5 + $0x8] sm:$0xff]  }
 0x6a6   : > { %3180 = vmatprep.subr.bf16.mxu1 %v3341_v49 }
 0x6a7   : > { %3159 = vmatmul.mubr.msk.bf16.vlgmr.msra.gmra.mrb[28].mxu0 %vm852_vm4, %v1333_v41 }
 0x6a8   : > { %3170 = vmatprep.mubr.msk.bf16.mxu0 %vm3512_vm1, %v3511_v11 }
 0x6d0   : > { %v1323_v32 = vpop.xlane.xlu1 %1322 }
 0x6d1   : > { %3400 = vrcp.f32 %v1323_v32 }
 0x6d4   : > { %v1481_v43 = vpop.permute.xlu1 %1480 }
 0x6d5   : > { %v1486_v42 = vsel %vm904_vm3, %v1481_v43, 0 }
 0x6d6   : > { %3169 = vmatpush3.bf16.msra.mxu0 %v1486_v42 }
 0x6db   : > { %v3401_v45 = vpop.eup %3400 }
 0x6dc   : > { %v1331_v13 = vmul.f32 %v3401_v45, %v3393_v18 }
 0x6de   : > { %v1335_v17 = vpack.c.bf16 %v1331_v13, %v1331_v13 }
 0x6e0   : > { %3171 = vmatmul.mubr.msk.bf16.vlgmr.msra.gmra.mrb[32].mxu0 %vm852_vm4, %v1335_v17  ;;  %v3342_v17 = vld [vmem:[%s4202_s5] sm:$0xff]  }
 0x6e1   : > { %3186 = vmatprep.subr.bf16.mxu0 %v3342_v17 }
 0x6e2   : > { %3187 = vmatpush3.bf16.msra.mxu0 %v3342_v17 }
 0x6e3   : > { %3188 = vmatprep.subr.bf16.mxu0 %v3343_v46 }
 0x6e6   : > { %3189 = vmatpush3.bf16.msra.mxu0 %v3343_v46 }
 0x749   : > { %v1378_v50 = vpop.f32.mrb[32].mxu1 }
 0x74a   : > { %v3154_v51 = vpop.f32.mrb[33].mxu1 }
 0x74b   : > { %v1381_v53 = vpop.f32.mrb[34].mxu1 }
 0x74c   : > { %v3155_v54 = vpop.f32.mrb[35].mxu1 }
 0x777   : > { %v1474_v55 = vpop.f32.mrb[36].mxu1 }
 0x778   : > { %v3166_v56 = vpop.f32.mrb[37].mxu1 }
 0x779   : > { %v1477_v57 = vpop.f32.mrb[38].mxu1 }
 0x77a   : > { %v1426_v58 = vpop.f32.mrb[28].mxu0  ;;  %v3167_v59 = vpop.f32.mrb[39].mxu1 }
 0x77b   : > { %v1528_v60 = vpack.c.bf16 %v1426_v58, %v1378_v50  ;;  %v3160_v61 = vpop.f32.mrb[29].mxu0 }
 0x77c   : > { %v1429_v62 = vpop.f32.mrb[30].mxu0  ;;  %v1718_v61 = vsub.s32 3, %v3659_v44 }
 0x77d   : > { %v3161_v63 = vpop.f32.mrb[31].mxu0  ;;  %3176 = vmatprep.mubr.msk.bf16.mxu1 %vm667_vm2, %v1528_v60 }
 0x77e   : > { %v1719_v63 = vrot.slane %v3665_v48, %v1718_v61 }
 0x7b3   : > { %v1522_v3 = vpop.f32.mrb[32].mxu0 }
 0x7b4   : > { %v1529_v4 = vpack.c.bf16 %v1522_v3, %v1474_v55  ;;  %v3172_v6 = vpop.f32.mrb[33].mxu0  ;;  %v1726_v3 = vsub.s32 4, %v3659_v44 }
 0x7b5   : > { %v1525_v8 = vpop.f32.mrb[34].mxu0 }
 0x7b6   : > { %v3173_v9 = vpop.f32.mrb[35].mxu0  ;;  %3177 = vmatmul.mubr.msk.bf16.vlgmr.msra.gmra.mrb[40].mxu1 %vm667_vm2, %v1529_v4 }
 0x7b7   : > { %3181 = vmatpush3.bf16.msra.mxu1 %v3341_v49  ;;  %3182 = vmatprep.mubr.msk.bf16.mxu1 %vm667_vm2, %v1086_v12 }
 0x7b8   : > { %3206 = vmatprep.subr.bf16.mxu1 %v3511_v11 }
 0x7c2   : > { %3183 = vmatmul.mubr.msk.bf16.vlgmr.msra.gmra.mrb[40].mxu1 %vm667_vm2, %v1087_v31 }
 0x7c3   : > { %3210 = vmatprep.mubr.msk.bf16.mxu1 %vm3512_vm1, %v3511_v11 }
 0x895   : > { %v3184_v15 = vpop.f32.mrb[40].mxu1 }
 0x896   : > { %v1637_v7 = vpop.f32.mrb[41].mxu1  ;;  %v1654_v10 = vadd.f32 %v3184_v15, %v3622_v1 }
 0x897   : > { %v1652_v12 = vadd.f32 %v1637_v7, %v3620_v0  ;;  %v3185_v18 = vpop.f32.mrb[42].mxu1 }
 0x898   : > { %v1640_v37 = vpop.f32.mrb[43].mxu1  ;;  %v3887_v31 = vadd.f32 %v1659_v16, %v1654_v10  ;;  %v1655_v20 = vadd.f32 %v3185_v18, %v3630_v5 }
 0x899   : > { %v3884_v19 = vadd.f32 %v1659_v16, %v1652_v12  ;;  %v1653_v30 = vadd.f32 %v1640_v37, %v3624_v2 }
 0x89a   : > { %v3896_v0 = vadd.f32 %v1659_v16, %v1655_v20  ;;  %v1670_v24 = vsel %vm366_vm0, %v3887_v31, 0.0 }
 0x89b   : > { %v3890_v21 = vadd.f32 %v1659_v16, %v1653_v30  ;;  %v1664_v23 = vsel %vm366_vm0, %v3884_v19, 0.0  ;;  %v1727_v16 = vrot.slane %v3665_v48, %v1726_v3  ;;  %v3344_v48 = vld [vmem:[%s4203_s6] sm:$0xff]  }
 0x89c   : > { %1665 = vadd.xlane.f32.xlu0 %v1664_v23  ;;  %v1673_v2 = vsel %vm366_vm0, %v3896_v0, 0.0  ;;  %3194 = vmatprep.subr.bf16.mxu0 %v3344_v48 }
 0x89d   : > { %v1667_v1 = vsel %vm366_vm0, %v3890_v21, 0.0 }
 0x89e   : > { %1668 = vadd.xlane.f32.xlu1 %v1667_v1 }
 0x8a0   : > { %1671 = vadd.xlane.f32.xlu0 %v1670_v24 }
 0x8a4   : > { %1674 = vadd.xlane.f32.xlu0 %v1673_v2 }
 0x929   : > { %v1666_v5 = vpop.xlane.xlu0 %1665 }
 0x92a   : > { %v1676_v40 = vmul.f32 0.03125, %v1666_v5 }
 0x92b   : > { %v1669_v25 = vpop.xlane.xlu1 %1668 }
 0x92c   : > { %v1680_v38 = vsub.f32 %v3884_v19, %v1676_v40  ;;  %v1677_v27 = vmul.f32 0.03125, %v1669_v25  ;;  %v3345_v25 = vld [vmem:[%s4203_s6 + $0x8] sm:$0xff]  }
 0x92d   : > { %v1672_v33 = vpop.xlane.xlu0 %1671 }
 0x92e   : > { %v1681_v28 = vsub.f32 %v3890_v21, %v1677_v27  ;;  %v1678_v29 = vmul.f32 0.03125, %v1672_v33  ;;  %v1684_v34 = vmul.f32 %v1680_v38, %v1680_v38  ;;  %v3347_v27 = vld [vmem:[%s4203_s6 + $0x18] sm:$0xff]   ;;  %v2879_v33 = vld [vmem:[%s4205_s8] ss:$0 sm:$0xff] }
 0x930   : > { %v1682_v35 = vsub.f32 %v3887_v31, %v1678_v29  ;;  %v1688_v36 = vsel %vm366_vm0, %v1684_v34, 0.0  ;;  %v1685_v22 = vmul.f32 %v1681_v28, %v1681_v28 }
 0x931   : > { %1689 = vadd.xlane.f32.xlu0 %v1688_v36  ;;  %v1675_v26 = vpop.xlane.xlu0 %1674 }
 0x932   : > { %v1679_v39 = vmul.f32 0.03125, %v1675_v26  ;;  %v1691_v41 = vsel %vm366_vm0, %v1685_v22, 0.0  ;;  %v1686_v32 = vmul.f32 %v1682_v35, %v1682_v35 }
 0x933   : > { %1692 = vadd.xlane.f32.xlu1 %v1691_v41 }
 0x934   : > { %v1683_v43 = vsub.f32 %v3896_v0, %v1679_v39  ;;  %v1694_v42 = vsel %vm366_vm0, %v1686_v32, 0.0 }
 0x935   : > { %1695 = vadd.xlane.f32.xlu0 %v1694_v42 }
 0x936   : > { %v1687_v45 = vmul.f32 %v1683_v43, %v1683_v43 }
 0x938   : > { %v1697_v13 = vsel %vm366_vm0, %v1687_v45, 0.0 }
 0x939   : > { %1698 = vadd.xlane.f32.xlu1 %v1697_v13 }
 0x9be   : > { %v1690_v49 = vpop.xlane.xlu0 %1689 }
 0x9bf   : > { %v1700_v50 = vmul.f32 0.03125, %v1690_v49 }
 0x9c0   : > { %v1693_v51 = vpop.xlane.xlu1 %1692 }
 0x9c1   : > { %v1704_v53 = vadd.f32 1e-05, %v1700_v50  ;;  %v1701_v54 = vmul.f32 0.03125, %v1693_v51 }
 0x9c2   : > { %v1696_v55 = vpop.xlane.xlu0 %1695 }
 0x9c3   : > { %3402 = vrsqrt.f32 %v1704_v53  ;;  %v1705_v56 = vadd.f32 1e-05, %v1701_v54  ;;  %v1702_v57 = vmul.f32 0.03125, %v1696_v55 }
 0x9c5   : > { %3404 = vrsqrt.f32 %v1705_v56  ;;  %v1706_v58 = vadd.f32 1e-05, %v1702_v57 }
 0x9c6   : > { %v1699_v59 = vpop.xlane.xlu1 %1698 }
 0x9c7   : > { %3406 = vrsqrt.f32 %v1706_v58  ;;  %v1703_v60 = vmul.f32 0.03125, %v1699_v59 }
 0x9c9   : > { %v1707_v62 = vadd.f32 1e-05, %v1703_v60 }
 0x9cb   : > { %3408 = vrsqrt.f32 %v1707_v62 }
 0x9cd   : > { %v3403_v4 = vpop.eup %3402 }
 0x9ce   : > { %v1712_v6 = vmul.f32 %v3403_v4, %v1680_v38  ;;  %v3346_v38 = vld [vmem:[%s4203_s6 + $0x10] sm:$0xff]  }
 0x9cf   : > { %v3405_v8 = vpop.eup %3404 }
 0x9d0   : > { %v1713_v9 = vmul.f32 %v3405_v8, %v1681_v28  ;;  %v1720_v15 = vmul.f32 %v1719_v63, %v1712_v6 }
 0x9d1   : > { %v3407_v7 = vpop.eup %3406 }
 0x9d2   : > { %v1714_v10 = vmul.f32 %v3407_v7, %v1682_v35  ;;  %v1721_v12 = vmul.f32 %v1719_v63, %v1713_v9  ;;  %v1728_v18 = vadd.f32 %v1727_v16, %v1720_v15 }
 0x9d4   : > { %v1729_v37 = vadd.f32 %v1727_v16, %v1721_v12  ;;  %v1722_v20 = vmul.f32 %v1719_v63, %v1714_v10 }
 0x9d5   : > { %v3409_v30 = vpop.eup %3408 }
 0x9d6   : > { %v1715_v23 = vmul.f32 %v3409_v30, %v1683_v43  ;;  %v1732_v1 = vpack.c.bf16 %v1729_v37, %v1728_v18  ;;  %v1730_v2 = vadd.f32 %v1727_v16, %v1722_v20 }
 0x9d8   : > { %v1723_v24 = vmul.f32 %v1719_v63, %v1715_v23  ;;  %3190 = vmatprep.mubr.msk.bf16.mxu0 %vm366_vm0, %v1732_v1 }
 0x9da   : > { %v1731_v5 = vadd.f32 %v1727_v16, %v1723_v24 }
 0x9dc   : > { %v1733_v40 = vpack.c.bf16 %v1731_v5, %v1730_v2  ;;  %v1931_v5 = vsub.s32 5, %v3659_v44 }
 0x9de   : > { %3191 = vmatmul.mubr.msk.bf16.vlgmr.msra.gmra.mrb[36].mxu0 %vm366_vm0, %v1733_v40  ;;  %v3446_v40 = vld [vmem:[%s4204_s7] sm:$0x3f] }
 0x9df   : > { %3195 = vmatpush3.bf16.msra.mxu0 %v3344_v48  ;;  %v1932_v48 = vrot.slane %v3446_v40, %v1931_v5 }
 0x9e0   : > { %3196 = vmatprep.subr.bf16.mxu0 %v3345_v25 }
 0x9e3   : > { %3197 = vmatpush3.bf16.msra.mxu0 %v3345_v25 }
 0x9e4   : > { %3198 = vmatprep.subr.bf16.mxu0 %v3346_v38 }
 0x9e7   : > { %3199 = vmatpush3.bf16.msra.mxu0 %v3346_v38 }
 0x9e8   : > { %3200 = vmatprep.subr.bf16.mxu0 %v3347_v27 }
 0x9eb   : > { %3201 = vmatpush3.bf16.msra.mxu0 %v3347_v27 }
 0x9ec   : > { %3222 = vmatprep.subr.bf16.mxu0 %v3511_v11 }
 0xab1   : > { %v3192_v28 = vpop.f32.mrb[36].mxu0 }
 0xab2   : > { %v1801_v29 = vadd.f32 %v3192_v28, %v2879_v33  ;;  %v1792_v34 = vpop.f32.mrb[37].mxu0 }
 0xab3   : > { %v1793_v35 = vadd.f32 %v2879_v33, %v1792_v34  ;;  %v3193_v36 = vpop.f32.mrb[38].mxu0 }
 0xab4   : > { %v1809_v22 = vmul.f32 %v1801_v29, %v1801_v29  ;;  %v1804_v26 = vadd.f32 %v3193_v36, %v2879_v33  ;;  %v1795_v39 = vpop.f32.mrb[39].mxu0 }
 0xab5   : > { %v1807_v41 = vmul.f32 %v1793_v35, %v1793_v35  ;;  %v1796_v32 = vadd.f32 %v2879_v33, %v1795_v39 }
 0xab6   : > { %v1813_v43 = vmul.f32 %v1809_v22, %v1801_v29  ;;  %v1810_v42 = vmul.f32 %v1804_v26, %v1804_v26 }
 0xab7   : > { %v1811_v45 = vmul.f32 %v1807_v41, %v1793_v35  ;;  %v1808_v13 = vmul.f32 %v1796_v32, %v1796_v32 }
 0xab8   : > { %v1817_v17 = vmul.f32 0.044715, %v1813_v43  ;;  %v1814_v46 = vmul.f32 %v1810_v42, %v1804_v26 }
 0xab9   : > { %v1815_v49 = vmul.f32 0.044715, %v1811_v45  ;;  %v1812_v50 = vmul.f32 %v1808_v13, %v1796_v32 }
 0xaba   : > { %v1821_v51 = vadd.f32 %v1817_v17, %v1801_v29  ;;  %v1818_v53 = vmul.f32 0.044715, %v1814_v46 }
 0xabb   : > { %v1819_v54 = vadd.f32 %v1815_v49, %v1793_v35  ;;  %v1816_v55 = vmul.f32 0.044715, %v1812_v50 }
 0xabc   : > { %v1825_v56 = vmul.f32 0.7978846, %v1821_v51  ;;  %v1822_v57 = vadd.f32 %v1818_v53, %v1804_v26 }
 0xabd   : > { %v1823_v58 = vmul.f32 0.7978846, %v1819_v54  ;;  %v1820_v59 = vadd.f32 %v1816_v55, %v1796_v32 }
 0xabe   : > { %3410 = vtanh.f32 %v1825_v56  ;;  %v1826_v60 = vmul.f32 0.7978846, %v1822_v57  ;;  %v3348_v56 = vld [vmem:[%s4198_s1 + $0x10] sm:$0xff]  }
 0xabf   : > { %3412 = vtanh.f32 %v1823_v58  ;;  %v1824_v62 = vmul.f32 0.7978846, %v1820_v59  ;;  %v3349_v57 = vld [vmem:[%s4200_s3 + $0x10] sm:$0xff]   ;;  %3207 = vmatpush3.bf16.msra.mxu1 %v3348_v56  ;;  %v3350_v58 = vld [vmem:[%s4198_s1 + $0x18] sm:$0xff]  }
 0xac0   : > { %3414 = vtanh.f32 %v1826_v60  ;;  %v3351_v59 = vld [vmem:[%s4200_s3 + $0x18] sm:$0xff]   ;;  %3208 = vmatprep.subr.bf16.mxu1 %v3511_v11 }
 0xac1   : > { %3416 = vtanh.f32 %v1824_v62 }
 0xac3   : > { %3209 = vmatpush3.bf16.msra.mxu1 %v3350_v58 }
 0xac4   : > { %3214 = vmatprep.subr.bf16.mxu1 %v3511_v11 }
 0xac8   : > { %v3411_v63 = vpop.eup %3410 }
 0xac9   : > { %v3413_v4 = vpop.eup %3412  ;;  %v1833_v6 = vadd.f32 1.0, %v3411_v63 }
 0xaca   : > { %v3415_v8 = vpop.eup %3414  ;;  %v1831_v9 = vadd.f32 1.0, %v3413_v4 }
 0xacb   : > { %v3417_v15 = vpop.eup %3416  ;;  %v1837_v16 = vmul.f32 0.5, %v1833_v6  ;;  %v1834_v7 = vadd.f32 1.0, %v3415_v8 }
 0xacc   : > { %v1835_v10 = vmul.f32 0.5, %v1831_v9  ;;  %v1832_v12 = vadd.f32 1.0, %v3417_v15  ;;  %v4008_v9 = vld [vmem:[%s4204_s7 + $0x8] sm:$0x3f] }
 0xacd   : > { %v1838_v18 = vmul.f32 0.5, %v1834_v7  ;;  %v1841_v30 = vmul.f32 %v1837_v16, %v1801_v29  ;;  %v2019_v15 = vrot.slane %v4008_v9, %v422_v47  ;;  %v3353_v47 = vld [vmem:[%s4199_s2 + $0x18] sm:$0xff]  }
 0xace   : > { %v1836_v37 = vmul.f32 0.5, %v1832_v12  ;;  %v1839_v23 = vmul.f32 %v1835_v10, %v1793_v35  ;;  %v2025_v12 = vrot.slane %v4008_v9, %v430_v52 }
 0xacf   : > { %v1842_v20 = vmul.f32 %v1838_v18, %v1804_v26 }
 0xad0   : > { %v1840_v1 = vmul.f32 %v1836_v37, %v1796_v32 }
 0xad1   : > { %v1844_v24 = vpack.c.bf16 %v1842_v20, %v1841_v30 }
 0xad2   : > { %v1843_v2 = vpack.c.bf16 %v1840_v1, %v1839_v23  ;;  %v3352_v1 = vld [vmem:[%s4199_s2 + $0x10] sm:$0xff]  }
 0xad4   : > { %3202 = vmatprep.mubr.msk.bf16.mxu0 %vm1869_vm5, %v1843_v2 }
 0xad5   : > { %3203 = vmatmul.mubr.msk.bf16.vlgmr.msra.gmra.mrb[40].mxu0 %vm1869_vm5, %v1844_v24 }
 0xad6   : > { %3226 = vmatprep.mubr.msk.bf16.mxu0 %vm3512_vm1, %v3511_v11  ;;  %3223 = vmatpush3.bf16.msra.mxu0 %v3349_v57 }
 0xad7   : > { %3224 = vmatprep.subr.bf16.mxu0 %v3511_v11 }
 0xada   : > { %3225 = vmatpush3.bf16.msra.mxu0 %v3351_v59 }
 0xadb   : > { %3236 = vmatprep.subr.bf16.mxu0 %v3511_v11 }
 0xba8   : > { %v3204_v25 = vpop.f32.mrb[40].mxu0 }
 0xba9   : > { %v1927_v38 = vadd.f32 %v3204_v25, %v3887_v31  ;;  %v1910_v27 = vpop.f32.mrb[41].mxu0 }
 0xbaa   : > { %v1925_v33 = vadd.f32 %v1910_v27, %v3884_v19  ;;  %v3205_v28 = vpop.f32.mrb[42].mxu0 }
 0xbab   : > { %v1935_v29 = vadd.f32 %v1932_v48, %v1927_v38  ;;  %v1928_v34 = vadd.f32 %v3205_v28, %v3896_v0  ;;  %v1913_v35 = vpop.f32.mrb[43].mxu0 }
 0xbac   : > { %v1933_v36 = vadd.f32 %v1932_v48, %v1925_v33  ;;  %v1926_v22 = vadd.f32 %v1913_v35, %v3890_v21 }
 0xbad   : > { %1939 = vst.msk [vmem:[%s3959_s29 + $0x10] sm:$0xff] %vm366_vm0, %v1935_v29  ;;  %v1936_v19 = vadd.f32 %v1932_v48, %v1928_v34 }
 0xbae   : > { %1937 = vst.msk [vmem:[%s3959_s29] sm:$0xff] %vm366_vm0, %v1933_v36  ;;  %v1934_v31 = vadd.f32 %v1932_v48, %v1926_v22 }
 0xbaf   : > { %1940 = vst.msk [vmem:[%s3959_s29 + $0x18] sm:$0xff] %vm366_vm0, %v1936_v19 }
 0xbb0   : > { %1938 = vst.msk [vmem:[%s3959_s29 + $0x8] sm:$0xff] %vm366_vm0, %v1934_v31 }
 0xbb4   : > { %v1946_v21 = vld [vmem:[%s3959_s29 + $0x10] sm:$0xf] }
 0xbb5   : > { %1947 = vst.msk [vmem:[#allocation2 + $0x8] sm:$0xf] %vm1942_vm6, %v1946_v21  ;;  %v1941_v0 = vld [vmem:[%s3959_s29] sm:$0xf] }
 0xbb6   : > { %v1948_v26 = vld [vmem:[%s3959_s29 + $0x18] sm:$0xf]  ;;  %1943 = vst.msk [vmem:[#allocation2] sm:$0xf] %vm1942_vm6, %v1941_v0 }
 0xbb7   : > { %1949 = vst.msk [vmem:[#allocation2 + $0xc] sm:$0xf] %vm1942_vm6, %v1948_v26  ;;  %v1944_v39 = vld [vmem:[%s3959_s29 + $0x8] sm:$0xf] }
 0xbb8   : > { %1945 = vst.msk [vmem:[#allocation2 + $0x4] sm:$0xf] %vm1942_vm6, %v1944_v39 }
 0xbbe   : > { %v3977_v41 = vld [vmem:[#allocation2 + $0x8] sm:$0xff] }
 0xbbf   : > { %v1993_v32 = vsel %vm366_vm0, %v3977_v41, 0.0  ;;  %v3981_v43 = vld [vmem:[#allocation2] sm:$0xff] }
 0xbc0   : > { %1994 = vadd.xlane.f32.xlu1 %v1993_v32  ;;  %v1990_v42 = vsel %vm366_vm0, %v3981_v43, 0.0 }
 0xbc1   : > { %1991 = vadd.xlane.f32.xlu0 %v1990_v42 }
 0xc4d   : > { %v1995_v45 = vpop.xlane.xlu1 %1994 }
 0xc4e   : > { %v1997_v13 = vmul.f32 0.03125, %v1995_v45  ;;  %v1992_v17 = vpop.xlane.xlu0 %1991 }
 0xc4f   : > { %v1996_v46 = vmul.f32 0.03125, %v1992_v17 }
 0xc50   : > { %v1999_v49 = vsub.f32 %v3977_v41, %v1997_v13 }
 0xc51   : > { %v1998_v50 = vsub.f32 %v3981_v43, %v1996_v46 }
 0xc52   : > { %v2001_v51 = vmul.f32 %v1999_v49, %v1999_v49 }
 0xc53   : > { %v2000_v53 = vmul.f32 %v1998_v50, %v1998_v50 }
 0xc54   : > { %v2005_v54 = vsel %vm366_vm0, %v2001_v51, 0.0 }
 0xc55   : > { %2006 = vadd.xlane.f32.xlu1 %v2005_v54  ;;  %v2002_v55 = vsel %vm366_vm0, %v2000_v53, 0.0 }
 0xc56   : > { %2003 = vadd.xlane.f32.xlu0 %v2002_v55 }
 0xce2   : > { %v2007_v60 = vpop.xlane.xlu1 %2006 }
 0xce3   : > { %v2009_v62 = vmul.f32 0.03125, %v2007_v60  ;;  %v2004_v63 = vpop.xlane.xlu0 %2003 }
 0xce4   : > { %v2008_v4 = vmul.f32 0.03125, %v2004_v63 }
 0xce5   : > { %v2011_v6 = vadd.f32 1e-05, %v2009_v62 }
 0xce6   : > { %v2010_v8 = vadd.f32 1e-05, %v2008_v4 }
 0xce7   : > { %3418 = vrsqrt.f32 %v2011_v6 }
 0xce8   : > { %3420 = vrsqrt.f32 %v2010_v8 }
 0xcf1   : > { %v3419_v16 = vpop.eup %3418 }
 0xcf2   : > { %v3421_v7 = vpop.eup %3420  ;;  %v2015_v10 = vmul.f32 %v3419_v16, %v1999_v49 }
 0xcf3   : > { %v2014_v18 = vmul.f32 %v3421_v7, %v1998_v50 }
 0xcf4   : > { %v2021_v37 = vmul.f32 %v2019_v15, %v2015_v10 }
 0xcf5   : > { %v2020_v30 = vmul.f32 %v2019_v15, %v2014_v18 }
 0xcf6   : > { %v2027_v20 = vadd.f32 %v2025_v12, %v2021_v37 }
 0xcf7   : > { %v2026_v23 = vadd.f32 %v2025_v12, %v2020_v30 }
 0xcf9   : > { %v2028_v24 = vpack.c.bf16 %v2027_v20, %v2026_v23 }
 0xcfb   : > { %3211 = vmatmul.mubr.msk.bf16.vlgmr.msra.gmra.mrb[44].mxu1 %vm366_vm0, %v2028_v24  ;;  %3227 = vmatmul.mubr.msk.bf16.vlgmr.msra.gmra.mrb[44].mxu0 %vm366_vm0, %v2028_v24 }
 0xcfc   : > { %3215 = vmatpush3.bf16.msra.mxu1 %v3352_v1  ;;  %3218 = vmatprep.mubr.msk.bf16.mxu1 %vm3512_vm1, %v3511_v11 }
 0xcfd   : > { %3216 = vmatprep.subr.bf16.mxu1 %v3511_v11  ;;  %3238 = vmatprep.mubr.msk.bf16.mxu0 %vm3512_vm1, %v3511_v11 }
 0xd00   : > { %3217 = vmatpush3.bf16.msra.mxu1 %v3353_v47 }
 0xd01   : > { %3230 = vmatprep.subr.bf16.mxu1 %v3511_v11 }
 0xd03   : > { %3219 = vmatmul.mubr.msk.bf16.vlgmr.msra.gmra.mrb[48].mxu1 %vm366_vm0, %v2028_v24 }
 0xd04   : > { %3232 = vmatprep.mubr.msk.bf16.mxu1 %vm3512_vm1, %v3511_v11 }
 0xdce   : > { %v2078_v52 = vpop.f32.mrb[44].mxu1  ;;  %v2188_v2 = vpop.f32.mrb[44].mxu0 }
 0xdcf   : > { %v3212_v40 = vpop.f32.mrb[45].mxu1  ;;  %v3228_v48 = vpop.f32.mrb[45].mxu0  ;;  %v2085_v27 = vmul.f32 0.25, %v2078_v52 }
 0xdd0   : > { %v2081_v25 = vpop.f32.mrb[46].mxu1  ;;  %v2191_v38 = vpop.f32.mrb[46].mxu0 }
 0xdd1   : > { %v2086_v33 = vmul.f32 0.25, %v2081_v25  ;;  %v4033_v28 = vpack.c.bf16 %v2191_v38, %v2188_v2  ;;  %v3213_v29 = vpop.f32.mrb[47].mxu1  ;;  %v3229_v34 = vpop.f32.mrb[47].mxu0  ;;  %v3355_v38 = vld [vmem:[%s4201_s4 + $0x18] sm:$0xff]  }
 0xdd3   : > { %v2087_v35 = vpack.c.bf16 %v2086_v33, %v2085_v27  ;;  %3237 = vmatpush3.bf16.msra.mxu0 %v4033_v28 }
 0xdd4   : > { %3248 = vmatprep.subr.bf16.mxu0 %v3511_v11 }
 0xdd5   : > { %2312 = vrot.lane.b32.xlu1 %v2087_v35, %s3513_s28 }
 0xdd6   : > { %v2134_v36 = vpop.f32.mrb[48].mxu1 }
 0xdd7   : > { %v3220_v22 = vpop.f32.mrb[49].mxu1 }
 0xdd8   : > { %v2137_v19 = vpop.f32.mrb[50].mxu1  ;;  %v3354_v22 = vld [vmem:[%s4201_s4 + $0x10] sm:$0xff]  }
 0xdd9   : > { %v2141_v31 = vpack.c.bf16 %v2137_v19, %v2134_v36  ;;  %v3221_v21 = vpop.f32.mrb[51].mxu1 }
 0xddb   : > { %v2200_v0 = vsel %vm667_vm2, %v2141_v31, 0  ;;  %2315 = vrot.lane.b32.xlu0 %v2141_v31, %s3513_s28 }
 0xddc   : > { %3231 = vmatpush3.bf16.xpose.msra.mxu1 %v2200_v0 }
 0xddd   : > { %3242 = vmatprep.subr.bf16.mxu1 %v3511_v11 }
 0xde3   : > { %3233 = vmatmul.mubr.msk.bf16.vlgmr.msra.gmra.mrb[52].mxu1 %vm667_vm2, %v2087_v35 }
 0xde4   : > { %3244 = vmatprep.mubr.msk.bf16.mxu1 %vm3512_vm1, %v3511_v11 }
 0xe47   : > { %v2313_v32 = vpop.permute.xlu1 %2312 }
 0xe4d   : > { %v2316_v26 = vpop.permute.xlu0 %2315 }
 0xe4e   : > { %v2321_v39 = vsel %vm667_vm2, %v2316_v26, 0 }
 0xe4f   : > { %3243 = vmatpush3.bf16.xpose.msra.mxu1 %v2321_v39 }
 0xe50   : > { %3254 = vmatprep.subr.bf16.mxu1 %v3511_v11 }
 0xe56   : > { %3245 = vmatmul.mubr.msk.bf16.vlgmr.msra.gmra.mrb[56].mxu1 %vm667_vm2, %v2313_v32 }
 0xe57   : > { %3256 = vmatprep.mubr.msk.bf16.mxu1 %vm3512_vm1, %v3511_v11  ;;  %3255 = vmatpush3.bf16.msra.mxu1 %v3355_v38 }
 0xe58   : > { %3266 = vmatprep.subr.bf16.mxu1 %v3511_v11 }
 0xeb6   : > { %v2236_v42 = vpop.f32.mrb[52].mxu1 }
 0xeb7   : > { %v3234_v45 = vpop.f32.mrb[53].mxu1  ;;  %v2243_v13 = vsel %vm667_vm2, %v2236_v42, -inf }
 0xeb8   : > { %2244 = vmax.xlane.f32.xlu1 %v2243_v13  ;;  %v2239_v17 = vpop.f32.mrb[54].mxu1 }
 0xeb9   : > { %v3235_v46 = vpop.f32.mrb[55].mxu1  ;;  %v2246_v49 = vsel %vm667_vm2, %v2239_v17, -inf }
 0xeba   : > { %2247 = vmax.xlane.f32.xlu0 %v2246_v49 }
 0xf29   : > { %v2357_v50 = vpop.f32.mrb[56].mxu1 }
 0xf2a   : > { %v3246_v51 = vpop.f32.mrb[57].mxu1  ;;  %v2364_v53 = vsel %vm667_vm2, %v2357_v50, -inf }
 0xf2b   : > { %2365 = vmax.xlane.f32.xlu0 %v2364_v53  ;;  %v2360_v54 = vpop.f32.mrb[58].mxu1 }
 0xf2c   : > { %v3247_v55 = vpop.f32.mrb[59].mxu1  ;;  %v2367_v56 = vsel %vm667_vm2, %v2360_v54, -inf }
 0xf2d   : > { %2368 = vmax.xlane.f32.xlu1 %v2367_v56  ;;  %v2541_v55 = vrot.slane %v4008_v9, %v1658_v14 }
 0xf45   : > { %v2245_v57 = vpop.xlane.xlu1 %2244 }
 0xf46   : > { %v2249_v58 = vsub.f32 %v2236_v42, %v2245_v57 }
 0xf47   : > { %v2248_v59 = vpop.xlane.xlu0 %2247 }
 0xf48   : > { %v2251_v60 = vmul.f32 1.442695, %v2249_v58  ;;  %v2250_v62 = vsub.f32 %v2239_v17, %v2248_v59 }
 0xf4a   : > { %3422 = vpow2.f32 %v2251_v60  ;;  %v2253_v63 = vmul.f32 1.442695, %v2250_v62 }
 0xf4c   : > { %3424 = vpow2.f32 %v2253_v63 }
 0xf54   : > { %v3423_v4 = vpop.eup %3422 }
 0xf55   : > { %v2255_v6 = vsel %vm667_vm2, %v3423_v4, 0.0 }
 0xf56   : > { %v3425_v8 = vpop.eup %3424  ;;  %2256 = vadd.xlane.f32.xlu0 %v2255_v6 }
 0xf57   : > { %v2258_v15 = vsel %vm667_vm2, %v3425_v8, 0.0 }
 0xf58   : > { %2259 = vadd.xlane.f32.xlu1 %v2258_v15 }
 0xfb8   : > { %v2366_v16 = vpop.xlane.xlu0 %2365 }
 0xfb9   : > { %v2370_v7 = vsub.f32 %v2357_v50, %v2366_v16 }
 0xfba   : > { %v2369_v10 = vpop.xlane.xlu1 %2368 }
 0xfbb   : > { %v2372_v12 = vmul.f32 1.442695, %v2370_v7  ;;  %v2371_v18 = vsub.f32 %v2360_v54, %v2369_v10 }
 0xfbd   : > { %3426 = vpow2.f32 %v2372_v12  ;;  %v2374_v37 = vmul.f32 1.442695, %v2371_v18 }
 0xfbf   : > { %3428 = vpow2.f32 %v2374_v37 }
 0xfc7   : > { %v3427_v30 = vpop.eup %3426 }
 0xfc8   : > { %v2376_v20 = vsel %vm667_vm2, %v3427_v30, 0.0 }
 0xfc9   : > { %v3429_v23 = vpop.eup %3428  ;;  %2377 = vadd.xlane.f32.xlu0 %v2376_v20  ;;  %v3357_v20 = vld [vmem:[%s4202_s5 + $0x18] sm:$0xff]  }
 0xfca   : > { %v2379_v1 = vsel %vm667_vm2, %v3429_v23, 0.0 }
 0xfcb   : > { %2380 = vadd.xlane.f32.xlu1 %v2379_v1 }
 0xfdf   : > { %2388 = vrot.lane.b32.xlu0 %v4033_v28, %s3513_s28  ;;  %s4142_s28 = scalar_lea.hbm %s4206_s9, %s2964_s21 }
 0xfe3   : > { %v2257_v24 = vpop.xlane.xlu0 %2256 }
 0xfe4   : > { %3430 = vrcp.f32 %v2257_v24 }
 0xfe5   : > { %v2260_v47 = vpop.xlane.xlu1 %2259 }
 0xfe6   : > { %3432 = vrcp.f32 %v2260_v47 }
 0xfee   : > { %v3431_v52 = vpop.eup %3430 }
 0xfef   : > { %v2263_v40 = vmul.f32 %v3431_v52, %v3423_v4 }
 0xff0   : > { %v3433_v2 = vpop.eup %3432 }
 0xff1   : > { %v2264_v48 = vmul.f32 %v3433_v2, %v3425_v8 }
 0xff3   : > { %v2265_v25 = vpack.c.bf16 %v2264_v48, %v2263_v40  ;;  %v2573_v48 = vrot.slane %v4008_v9, %v1718_v61  ;;  %v3359_v61 = vld [vmem:[%s4203_s6 + $0x28] sm:$0xff]  }
 0xff5   : > { %3239 = vmatmul.mubr.msk.bf16.vlgmr.msra.gmra.mrb[48].mxu0 %vm667_vm2, %v2265_v25 }
 0xff6   : > { %3250 = vmatprep.mubr.msk.bf16.mxu0 %vm3512_vm1, %v3511_v11 }
0x1056   : > { %v2378_v27 = vpop.xlane.xlu0 %2377 }
0x1057   : > { %3434 = vrcp.f32 %v2378_v27 }
0x1058   : > { %v2381_v33 = vpop.xlane.xlu1 %2380 }
0x1059   : > { %3436 = vrcp.f32 %v2381_v33 }
0x105a   : > { %v2389_v28 = vpop.permute.xlu0 %2388 }
0x105b   : > { %3249 = vmatpush3.bf16.msra.mxu0 %v2389_v28  ;;  %v2579_v28 = vrot.slane %v4008_v9, %v1726_v3  ;;  %v3360_v3 = vld [vmem:[%s4203_s6 + $0x30] sm:$0xff]  }
0x105c   : > { %3260 = vmatprep.subr.bf16.mxu0 %v3511_v11 }
0x1061   : > { %v3435_v29 = vpop.eup %3434 }
0x1062   : > { %v2384_v35 = vmul.f32 %v3435_v29, %v3427_v30  ;;  %v3356_v30 = vld [vmem:[%s4202_s5 + $0x10] sm:$0xff]  }
0x1063   : > { %v3437_v34 = vpop.eup %3436 }
0x1064   : > { %v2385_v36 = vmul.f32 %v3437_v34, %v3429_v23 }
0x1066   : > { %v2386_v19 = vpack.c.bf16 %v2385_v36, %v2384_v35 }
0x1068   : > { %3251 = vmatmul.mubr.msk.bf16.vlgmr.msra.gmra.mrb[52].mxu0 %vm667_vm2, %v2386_v19  ;;  %v3361_v19 = vld [vmem:[%s4203_s6 + $0x38] sm:$0xff]  }
0x1069   : > { %3261 = vmatpush3.bf16.msra.mxu0 %v3354_v22  ;;  %3262 = vmatprep.mubr.msk.bf16.mxu0 %vm3512_vm1, %v3511_v11  ;;  %v3358_v22 = vld [vmem:[%s4203_s6 + $0x20] sm:$0xff]  }
0x106a   : > { %3274 = vmatprep.subr.bf16.mxu0 %v3511_v11 }
0x10c8   : > { %v2303_v31 = vpop.f32.mrb[48].mxu0 }
0x10c9   : > { %v3240_v21 = vpop.f32.mrb[49].mxu0 }
0x10ca   : > { %v2306_v0 = vpop.f32.mrb[50].mxu0 }
0x10cb   : > { %v2310_v26 = vpack.c.bf16 %v2306_v0, %v2303_v31  ;;  %v3241_v39 = vpop.f32.mrb[51].mxu0  ;;  %v2937_v31 = vld [vmem:[%s4205_s8 + $0x1] ss:$0 sm:$0xff] }
0x10cd   : > { %3263 = vmatmul.mubr.msk.bf16.vlgmr.msra.gmra.mrb[56].mxu0 %vm667_vm2, %v2310_v26 }
0x10ce   : > { %3282 = vmatprep.mubr.msk.bf16.mxu0 %vm3512_vm1, %v3511_v11  ;;  %3275 = vmatpush3.bf16.msra.mxu0 %v3358_v22 }
0x10cf   : > { %3276 = vmatprep.subr.bf16.mxu0 %v3511_v11 }
0x10d2   : > { %3277 = vmatpush3.bf16.msra.mxu0 %v3359_v61 }
0x10d3   : > { %3278 = vmatprep.subr.bf16.mxu0 %v3511_v11 }
0x10d6   : > { %3279 = vmatpush3.bf16.msra.mxu0 %v3360_v3 }
0x10d7   : > { %3280 = vmatprep.subr.bf16.mxu0 %v3511_v11 }
0x10da   : > { %3281 = vmatpush3.bf16.msra.mxu0 %v3361_v19 }
0x113b   : > { %v2428_v32 = vpop.f32.mrb[52].mxu0 }
0x113c   : > { %v3252_v42 = vpop.f32.mrb[53].mxu0 }
0x113d   : > { %v2431_v45 = vpop.f32.mrb[54].mxu0 }
0x113e   : > { %v2435_v13 = vpack.c.bf16 %v2431_v45, %v2428_v32  ;;  %v3253_v17 = vpop.f32.mrb[55].mxu0 }
0x1140   : > { %3257 = vmatmul.mubr.msk.bf16.vlgmr.msra.gmra.mrb[60].mxu1 %vm667_vm2, %v2435_v13 }
0x1141   : > { %3270 = vmatprep.mubr.msk.bf16.mxu1 %vm3512_vm1, %v3511_v11  ;;  %3267 = vmatpush3.bf16.msra.mxu1 %v3356_v30 }
0x1142   : > { %3268 = vmatprep.subr.bf16.mxu1 %v3511_v11 }
0x1145   : > { %3269 = vmatpush3.bf16.msra.mxu1 %v3357_v20 }
0x11a0   : > { %v2529_v46 = vpop.f32.mrb[56].mxu0 }
0x11a1   : > { %v3264_v49 = vpop.f32.mrb[57].mxu0 }
0x11a2   : > { %v2532_v50 = vpop.f32.mrb[58].mxu0 }
0x11a3   : > { %v3265_v51 = vpop.f32.mrb[59].mxu0 }
0x1213   : > { %v2479_v53 = vpop.f32.mrb[60].mxu1 }
0x1214   : > { %v2530_v54 = vadd.f32 %v2529_v46, %v2479_v53  ;;  %v3258_v56 = vpop.f32.mrb[61].mxu1 }
0x1215   : > { %v2482_v57 = vpop.f32.mrb[62].mxu1 }
0x1216   : > { %v2536_v58 = vadd.f32 %v2530_v54, %v3981_v43  ;;  %v2533_v59 = vadd.f32 %v2532_v50, %v2482_v57  ;;  %v3259_v60 = vpop.f32.mrb[63].mxu1 }
0x1218   : > { %v4084_v62 = vadd.f32 %v2541_v55, %v2536_v58  ;;  %v2537_v63 = vadd.f32 %v2533_v59, %v3977_v41 }
0x121a   : > { %v4087_v4 = vadd.f32 %v2541_v55, %v2537_v63  ;;  %v2544_v6 = vsel %vm366_vm0, %v4084_v62, 0.0 }
0x121b   : > { %2545 = vadd.xlane.f32.xlu1 %v2544_v6 }
0x121c   : > { %v2547_v8 = vsel %vm366_vm0, %v4087_v4, 0.0 }
0x121f   : > { %2548 = vadd.xlane.f32.xlu1 %v2547_v8 }
0x12a8   : > { %v2546_v14 = vpop.xlane.xlu1 %2545 }
0x12a9   : > { %v2550_v15 = vmul.f32 0.03125, %v2546_v14  ;;  %v2737_v14 = vrot.slane %v4008_v9, %v1931_v5 }
0x12ab   : > { %v2552_v43 = vsub.f32 %v4084_v62, %v2550_v15 }
0x12ac   : > { %v2549_v16 = vpop.xlane.xlu1 %2548 }
0x12ad   : > { %v2551_v7 = vmul.f32 0.03125, %v2549_v16  ;;  %v2554_v10 = vmul.f32 %v2552_v43, %v2552_v43 }
0x12af   : > { %v2553_v12 = vsub.f32 %v4087_v4, %v2551_v7  ;;  %v2556_v41 = vsel %vm366_vm0, %v2554_v10, 0.0 }
0x12b0   : > { %2557 = vadd.xlane.f32.xlu1 %v2556_v41 }
0x12b1   : > { %v2555_v18 = vmul.f32 %v2553_v12, %v2553_v12 }
0x12b3   : > { %v2559_v37 = vsel %vm366_vm0, %v2555_v18, 0.0 }
0x12b4   : > { %2560 = vadd.xlane.f32.xlu1 %v2559_v37 }
0x133d   : > { %v2558_v23 = vpop.xlane.xlu1 %2557 }
0x133e   : > { %v2562_v1 = vmul.f32 0.03125, %v2558_v23 }
0x1340   : > { %v2564_v24 = vadd.f32 1e-05, %v2562_v1 }
0x1341   : > { %v2561_v47 = vpop.xlane.xlu1 %2560 }
0x1342   : > { %3438 = vrsqrt.f32 %v2564_v24  ;;  %v2563_v52 = vmul.f32 0.03125, %v2561_v47 }
0x1344   : > { %v2565_v2 = vadd.f32 1e-05, %v2563_v52 }
0x1346   : > { %3440 = vrsqrt.f32 %v2565_v2 }
0x134c   : > { %v3439_v40 = vpop.eup %3438 }
0x134d   : > { %v2568_v25 = vmul.f32 %v3439_v40, %v2552_v43 }
0x134f   : > { %v2574_v27 = vmul.f32 %v2573_v48, %v2568_v25 }
0x1350   : > { %v3441_v38 = vpop.eup %3440 }
0x1351   : > { %v2569_v33 = vmul.f32 %v3441_v38, %v2553_v12  ;;  %v2580_v34 = vadd.f32 %v2579_v28, %v2574_v27 }
0x1353   : > { %v2575_v29 = vmul.f32 %v2573_v48, %v2569_v33 }
0x1355   : > { %v2581_v35 = vadd.f32 %v2579_v28, %v2575_v29 }
0x1357   : > { %v2582_v36 = vpack.c.bf16 %v2581_v35, %v2580_v34 }
0x1359   : > { %3271 = vmatmul.mubr.msk.bf16.vlgmr.msra.gmra.mrb[64].mxu1 %vm366_vm0, %v2582_v36 }
0x142c   : > { %v2638_v21 = vpop.f32.mrb[64].mxu1 }
0x142d   : > { %v2639_v0 = vadd.f32 %v2937_v31, %v2638_v21  ;;  %v3272_v26 = vpop.f32.mrb[65].mxu1 }
0x142e   : > { %v2641_v39 = vpop.f32.mrb[66].mxu1 }
0x142f   : > { %v2645_v32 = vmul.f32 %v2639_v0, %v2639_v0  ;;  %v2642_v42 = vadd.f32 %v2937_v31, %v2641_v39  ;;  %v3273_v45 = vpop.f32.mrb[67].mxu1 }
0x1431   : > { %v2647_v13 = vmul.f32 %v2645_v32, %v2639_v0  ;;  %v2646_v17 = vmul.f32 %v2642_v42, %v2642_v42 }
0x1433   : > { %v2649_v46 = vmul.f32 0.044715, %v2647_v13  ;;  %v2648_v11 = vmul.f32 %v2646_v17, %v2642_v42 }
0x1435   : > { %v2651_v49 = vadd.f32 %v2649_v46, %v2639_v0  ;;  %v2650_v50 = vmul.f32 0.044715, %v2648_v11 }
0x1437   : > { %v2653_v51 = vmul.f32 0.7978846, %v2651_v49  ;;  %v2652_v53 = vadd.f32 %v2650_v50, %v2642_v42 }
0x1439   : > { %3442 = vtanh.f32 %v2653_v51  ;;  %v2654_v54 = vmul.f32 0.7978846, %v2652_v53 }
0x143b   : > { %3444 = vtanh.f32 %v2654_v54 }
0x1443   : > { %v3443_v55 = vpop.eup %3442 }
0x1444   : > { %v2657_v56 = vadd.f32 1.0, %v3443_v55 }
0x1445   : > { %v3445_v57 = vpop.eup %3444 }
0x1446   : > { %v2659_v58 = vmul.f32 0.5, %v2657_v56  ;;  %v2658_v59 = vadd.f32 1.0, %v3445_v57 }
0x1448   : > { %v2660_v60 = vmul.f32 0.5, %v2658_v59  ;;  %v2661_v63 = vmul.f32 %v2659_v58, %v2639_v0 }
0x144a   : > { %v2662_v6 = vmul.f32 %v2660_v60, %v2642_v42 }
0x144c   : > { %v2663_v8 = vpack.c.bf16 %v2662_v6, %v2661_v63 }
0x144e   : > { %3283 = vmatmul.mubr.msk.bf16.vlgmr.msra.gmra.mrb[60].mxu0 %vm1869_vm5, %v2663_v8 }
0x1521   : > { %v2725_v15 = vpop.f32.mrb[60].mxu0 }
0x1522   : > { %v2732_v43 = vadd.f32 %v2725_v15, %v4084_v62  ;;  %v3284_v16 = vpop.f32.mrb[61].mxu0 }
0x1523   : > { %v2728_v7 = vpop.f32.mrb[62].mxu0 }
0x1524   : > { %v2738_v10 = vadd.f32 %v2737_v14, %v2732_v43  ;;  %v2733_v12 = vadd.f32 %v2728_v7, %v4087_v4  ;;  %v3285_v41 = vpop.f32.mrb[63].mxu0 }
0x1526   : > { %2740 = vst.msk [vmem:[#allocation2] sm:$0xff] %vm366_vm0, %v2738_v10  ;;  %v2739_v18 = vadd.f32 %v2737_v14, %v2733_v12 }
0x1528   : > { %2741 = vst.msk [vmem:[#allocation2 + $0x8] sm:$0xff] %vm366_vm0, %v2739_v18 }
0x152d   : > { %v2742_v44 = vld [vmem:[#allocation2] sm:$0xf]  ;;  %v2744_v5 = vld [vmem:[#allocation2 + $0x4] sm:$0xf] }
0x152e   : > { %2743 = vst.msk [vmem:[%s3959_s29] sm:$0xf] %vm1942_vm6, %v2742_v44  ;;  %2745 = vst.msk [vmem:[%s3959_s29 + $0x8] sm:$0xf] %vm1942_vm6, %v2744_v5 }
0x152f   : > { %v2746_v9 = vld [vmem:[#allocation2 + $0x8] sm:$0xf]  ;;  %v2748_v62 = vld [vmem:[#allocation2 + $0xc] sm:$0xf] }
0x1530   : > { %2747 = vst.msk [vmem:[%s3959_s29 + $0x10] sm:$0xf] %vm1942_vm6, %v2746_v9  ;;  %2749 = vst.msk [vmem:[%s3959_s29 + $0x18] sm:$0xf] %vm1942_vm6, %v2748_v62 }
0x1531   : > { %3460 = shalt.err (!%p3457_p3)
}
0x1532   : > { %s3461_s24 = scalar_lea.hbm %s4142_s28, 512  ;;  %s3465_s21 = scalar_lea.hbm %s4206_s9, 1024 }
0x1533   : > { %p3462_p4 = scmp.ne.s32.totalorder %s4142_s28, %s3461_s24  ;;  %p3466_p9 = scmp.lt.u32.totalorder %s4142_s28, %s4206_s9 }
0x1534   : > { %p3467_p10 = scmp.lt.u32.totalorder %s3465_s21, %s3461_s24  ;;  %p3469_p12 = scmp.lt.u32.totalorder %s3461_s24, %s4142_s28 }
0x1535   : > { %p3463_p7 = pnand %p3462_p4, %p3605_p5 }
0x1536   : > { %p3468_p11 = por %p3467_p10, %p3466_p9 }
0x1537   : > { %p3464_p8 = pneg %p3463_p7 }
0x1538   : > { %p3470_p13 = por %p3469_p12, %p3468_p11 }
0x153a   : > { %p3471_p0 = pnand %p3470_p13, %p3464_p8 }
0x153c   : > { %3474 = shalt.err (!%p3471_p0)
}
0x153d   : > { %s3515_s26 = smov 128   ;;  %s3516_s27 = smov 8  }
0x153e   : > { %3290 = dma.vmem_to_hbm [thread:$0]  (%p3605_p5), %s4144_s22, 512, %s4142_s28, %s4156_s13, %s3515_s26, %s3515_s26, %s3516_s27  }
0x153f PF: > { %p3296_p1 = scmp.ge.s32.totalorder %s3509_s12, 2  ;;  %s2779_s14 = sand.u32 1, %s3497_s30  }
0x1540   : > { %s2780_s16 = scalar_lea.sflag [#allocation4], %s2779_s14 }
0x1541   : > { %p3293_p2 = pnand %p3296_p1, %p3609_p6 }
0x1543   : > { %3492 = dma.done.wait (!%p3293_p2), %s2780_s16, 512  }
0x1544   : > { %3494 = vsyncadd (!%p3293_p2), %s2780_s16, 4294966784  ;;  %p19_p3 = scmp.ge.s32.totalorder %s3592_s15, 4   ;;  %s4209_s30 = smov %s3501_s10 }
0x1545   : > { %s4210_s10 = smov %s3505_s11  ;;  %s4211_s11 = smov %s3603_s18 }
0x1546   : > { %s4212_s12 = smov %s3592_s15  ;;  %21 = sbr.rel (!%p19_p3) target bundleno = 3 (0x3), region = 99 }
0x154d   :  { %2785 = vsyncpa [#allocation4], 1 }
0x154e   :  { %2787 = vsyncpa [#allocation4 + $0x1], 1 }

</bundles_post_ra>
